<compile_context>
chip_gen: v7x
topology: tpu7x:2x2x1
jax: 0.10.0
libtpu: 0.0.40
codegen_flags: <defaults>
</compile_context>

<pallas_src>
import jax
import jax.numpy as jnp
import numpy as np
from jax.experimental import pallas as pl

# ---------------- configuration (matches module __init__) -------------------
EMB = 32          # embedding_dim
HEADS = 4         # num_heads
HEAD_DIM = EMB // HEADS
CURVATURE = 1.0   # Poincare ball curvature c

_MIN_NORM = 1e-15     # geoopt's denom.clamp_min
_ATANH_EPS = 1e-7     # geoopt's artanh clamp (version-dependent eps)
# TODO(synk): geoopt's artanh clamp eps differs across versions (1e-5 vs 1e-7);
# 1e-7 is used here — only matters when points approach the ball boundary.


# ------------------------- single fused forward kernel ----------------------
def _fused_mhha_kernel(xq_ref, xk_ref, xv_ref, wqkv_ref, bqkv_ref, wo_ref,
                       bo_ref, y_ref, attn_ref):
    """Single-invocation fused forward.

    xq/xk/xv : (B*S, E)      flattened query / key / value
    wqkv     : (3, H, E, Dh) head-major, pre-transposed Q/K/V projection weights
    bqkv     : (3, H, 1, Dh) matching biases
    wo       : (H, Dh, E)    head-major row blocks of W_o^T
    bo       : (1, E)
    y        : (B*S, E)      final projected output
    attn     : (B, H, S, S)  row-normalized exp(-dist) attention weights
    """
    c = CURVATURE
    sqrt_c = c ** 0.5
    B, H, S, _ = attn_ref.shape
    BS, E = xq_ref.shape

    xq = xq_ref[...]
    xk = xk_ref[...]
    xv = xv_ref[...]
    bo = bo_ref[...]

    y_acc = [None] * B
    for h in range(H):                       # fully unrolled (H = 4)
        # Per-head projections for every (batch, seq) row at once: (B*S, Dh).
        q_h = jnp.dot(xq, wqkv_ref[0, h], preferred_element_type=jnp.float32) + bqkv_ref[0, h]
        k_h = jnp.dot(xk, wqkv_ref[1, h], preferred_element_type=jnp.float32) + bqkv_ref[1, h]
        v_h = jnp.dot(xv, wqkv_ref[2, h], preferred_element_type=jnp.float32) + bqkv_ref[2, h]
        wo_h = wo_ref[h]                     # (Dh, E)

        for b in range(B):                   # fully unrolled (B = 2)
            r0 = b * S
            qb = q_h[r0:r0 + S, :]           # (S, Dh)
            kb = k_h[r0:r0 + S, :]
            vb = v_h[r0:r0 + S, :]

            # Pairwise quantities for the Poincare distance.
            xy = jnp.dot(qb, kb.T, preferred_element_type=jnp.float32)     # <q_i,k_j> (S,S)
            x2 = jnp.sum(qb * qb, axis=-1, keepdims=True)                  # ||q_i||^2 (S,1)
            y2 = jnp.transpose(jnp.sum(kb * kb, axis=-1, keepdims=True))   # ||k_j||^2 (1,S)

            # Mobius addition (-x) (+)_c y via dot products:
            #   num = A*(-x) + Bq*y,  A = 1 - 2c<x,y> + c||y||^2,  Bq = 1 - c||x||^2
            #   den = 1 - 2c<x,y> + c^2 ||x||^2 ||y||^2
            A = 1.0 - 2.0 * c * xy + c * y2
            Bq = 1.0 - c * x2
            den = jnp.maximum(1.0 - 2.0 * c * xy + (c * c) * x2 * y2, _MIN_NORM)
            num_sq = jnp.maximum(A * A * x2 - 2.0 * A * Bq * xy + Bq * Bq * y2, 0.0)
            mob_norm = jnp.sqrt(num_sq) / den

            # dist = 2/sqrt(c) * artanh(sqrt(c)*||.||)  — single-log artanh.
            arg = jnp.clip(sqrt_c * mob_norm, -1.0 + _ATANH_EPS, 1.0 - _ATANH_EPS)
            dist = (1.0 / sqrt_c) * jnp.log(
                (1.0 + arg) * pl.reciprocal(1.0 - arg, approx=False))

            # exp(-dist) attention, row-normalized via reciprocal.
            e = jnp.exp(-dist)
            w = e * pl.reciprocal(jnp.sum(e, axis=-1, keepdims=True), approx=False)
            attn_ref[b, h] = w.astype(attn_ref.dtype)

            # Fold the head output straight into the output projection:
            #   y_b += (w @ v_h) @ Wo^T[h*Dh:(h+1)*Dh, :]
            out_bh = jnp.dot(w, vb, preferred_element_type=jnp.float32)          # (S, Dh)
            contrib = jnp.dot(out_bh, wo_h, preferred_element_type=jnp.float32)  # (S, E)
            y_acc[b] = contrib if y_acc[b] is None else y_acc[b] + contrib

    for b in range(B):
        y_ref[b * S:(b + 1) * S, :] = (y_acc[b] + bo).astype(y_ref.dtype)


def mhha_forward(query, key, value, packed):
    """query/key/value: (B, S, E) f32; packed: head-major params from pack_params."""
    B, S, E = query.shape
    BS = B * S
    y_flat, attn = pl.pallas_call(
        _fused_mhha_kernel,
        out_shape=(
            jax.ShapeDtypeStruct((BS, E), jnp.float32),
            jax.ShapeDtypeStruct((B, HEADS, S, S), jnp.float32),
        ),
    )(query.reshape(BS, E), key.reshape(BS, E), value.reshape(BS, E),
      packed["wqkv"], packed["bqkv"], packed["wo"], packed["bo"])
    return y_flat.reshape(B, S, E), attn


# ----------------------------- parameter handling ----------------------------
def init_params(key):
    """Torch-style nn.Linear params: W (out,in), b (out,)."""
    bound = 1.0 / (EMB ** 0.5)
    keys = jax.random.split(key, 8)

    def lin(kw, kb):
        w = jax.random.uniform(kw, (EMB, EMB), jnp.float32, -bound, bound)
        b = jax.random.uniform(kb, (EMB,), jnp.float32, -bound, bound)
        return w, b

    wq, bq = lin(keys[0], keys[1])
    wk, bk = lin(keys[2], keys[3])
    wv, bv = lin(keys[4], keys[5])
    wo, bo = lin(keys[6], keys[7])
    return dict(wq=wq, bq=bq, wk=wk, bk=bk, wv=wv, bv=bv, wo=wo, bo=bo)


def pack_params(p):
    """One-time host-side repack: pre-transposed, head-major kernel layout."""
    H, Dh, E = HEADS, HEAD_DIM, EMB

    def heads_of(w):                      # torch W (out,in) -> (H, E_in, Dh)
        return jnp.transpose(w.T.reshape(E, H, Dh), (1, 0, 2))

    wqkv = jnp.stack([heads_of(p["wq"]), heads_of(p["wk"]), heads_of(p["wv"])], axis=0)   # (3,H,E,Dh)
    bqkv = jnp.stack([p["bq"].reshape(H, 1, Dh),
                      p["bk"].reshape(H, 1, Dh),
                      p["bv"].reshape(H, 1, Dh)], axis=0)                                  # (3,H,1,Dh)
    wo = p["wo"].T.reshape(H, Dh, E)                                                       # (H,Dh,E)
    bo = p["bo"][None, :]                                                                  # (1,E)
    return dict(wqkv=wqkv, bqkv=bqkv, wo=wo, bo=bo)


# -------------------------- pure-JAX reference -------------------------------
def reference(query, key_in, value, params):
    c = CURVATURE
    B, S, E = query.shape

    def lin(x, w, b):
        return x @ w.T + b

    q = lin(query, params["wq"], params["bq"]).reshape(B, S, HEADS, HEAD_DIM).transpose(0, 2, 1, 3)
    k = lin(key_in, params["wk"], params["bk"]).reshape(B, S, HEADS, HEAD_DIM).transpose(0, 2, 1, 3)
    v = lin(value, params["wv"], params["bv"]).reshape(B, S, HEADS, HEAD_DIM).transpose(0, 2, 1, 3)

    x = q[:, :, :, None, :]   # (B,H,S,1,D)
    y = k[:, :, None, :, :]   # (B,H,1,S,D)
    xy = jnp.sum(x * y, -1)
    x2 = jnp.sum(x * x, -1)
    y2 = jnp.sum(y * y, -1)
    A = 1.0 - 2.0 * c * xy + c * y2
    Bq = 1.0 - c * x2
    den = jnp.maximum(1.0 - 2.0 * c * xy + c * c * x2 * y2, _MIN_NORM)
    num = A[..., None] * (-x) + Bq[..., None] * y          # explicit Mobius-add numerator
    mob_norm = jnp.linalg.norm(num, axis=-1) / den
    arg = jnp.clip(jnp.sqrt(c) * mob_norm, -1.0 + _ATANH_EPS, 1.0 - _ATANH_EPS)
    dist = (2.0 / jnp.sqrt(c)) * 0.5 * (jnp.log(1.0 + arg) - jnp.log(1.0 - arg))
    w = jnp.exp(-dist)
    w = w / jnp.sum(w, -1, keepdims=True)
    out = jnp.einsum("bhqk,bhkd->bhqd", w, v)
    out = out.transpose(0, 2, 1, 3).reshape(B, S, E)
    return lin(out, params["wo"], params["bo"]), w


# ----------------------------------- main ------------------------------------
if __name__ == "__main__":
    root = jax.random.PRNGKey(0)
    kq, kk, kv, kp = jax.random.split(root, 4)
    B, S = 2, 8
    query = 0.1 * jax.random.normal(kq, (B, S, EMB), jnp.float32)
    key_in = 0.1 * jax.random.normal(kk, (B, S, EMB), jnp.float32)
    value = 0.1 * jax.random.normal(kv, (B, S, EMB), jnp.float32)

    params = init_params(kp)
    packed = pack_params(params)

    fwd = jax.jit(mhha_forward)
    out, attn = fwd(query, key_in, value, packed)
    jax.block_until_ready((out, attn))

    ref_out, ref_attn = reference(query, key_in, value, params)
    assert out.shape == (B, S, EMB) and attn.shape == (B, HEADS, S, S)
    assert np.allclose(np.asarray(out), np.asarray(ref_out), rtol=2e-3, atol=2e-4)
    assert np.allclose(np.asarray(attn), np.asarray(ref_attn), rtol=2e-3, atol=2e-4)
    print("KERNEL_OK")
</pallas_src>

<mosaic_0001>
module attributes {stable_mosaic.version = 11 : i64} {
  func.func @_fused_mhha_kernel(%arg0: memref<16x32xf32, #tpu.memory_space<vmem>>, %arg1: memref<16x32xf32, #tpu.memory_space<vmem>>, %arg2: memref<16x32xf32, #tpu.memory_space<vmem>>, %arg3: memref<3x4x32x8xf32, #tpu.memory_space<vmem>>, %arg4: memref<3x4x1x8xf32, #tpu.memory_space<vmem>>, %arg5: memref<4x8x32xf32, #tpu.memory_space<vmem>>, %arg6: memref<1x32xf32, #tpu.memory_space<vmem>>, %arg7: memref<16x32xf32, #tpu.memory_space<vmem>>, %arg8: memref<2x4x8x8xf32, #tpu.memory_space<vmem>>) attributes {dimension_semantics = [], scalar_prefetch = 0 : i64, scratch_operands = 0 : i64, tpu.core_type = #tpu.core_type<tc>} {
    %c0 = arith.constant 0 : index
    %c0_0 = arith.constant 0 : index
    %0 = vector.load %arg0[%c0, %c0_0] : memref<16x32xf32, #tpu.memory_space<vmem>>, vector<16x32xf32>
    %c0_1 = arith.constant 0 : index
    %c0_2 = arith.constant 0 : index
    %1 = vector.load %arg1[%c0_1, %c0_2] : memref<16x32xf32, #tpu.memory_space<vmem>>, vector<16x32xf32>
    %c0_3 = arith.constant 0 : index
    %c0_4 = arith.constant 0 : index
    %2 = vector.load %arg2[%c0_3, %c0_4] : memref<16x32xf32, #tpu.memory_space<vmem>>, vector<16x32xf32>
    %c0_5 = arith.constant 0 : index
    %c0_6 = arith.constant 0 : index
    %3 = vector.load %arg6[%c0_5, %c0_6] : memref<1x32xf32, #tpu.memory_space<vmem>>, vector<1x32xf32>
    %c0_7 = arith.constant 0 : index
    %c0_8 = arith.constant 0 : index
    %c0_9 = arith.constant 0 : index
    %c0_10 = arith.constant 0 : index
    %4 = vector.load %arg3[%c0_7, %c0_8, %c0_9, %c0_10] : memref<3x4x32x8xf32, #tpu.memory_space<vmem>>, vector<1x1x32x8xf32>
    %5 = vector.shape_cast %4 : vector<1x1x32x8xf32> to vector<32x8xf32>
    %cst = arith.constant dense<0.000000e+00> : vector<16x8xf32>
    %6 = tpu.matmul %0, %5, %cst {dimension_numbers = #tpu.dot_dimension_numbers<[1], [0], [0], [1], [0, 0, 1, 1], [], []>} : vector<16x32xf32>, vector<32x8xf32>, vector<16x8xf32> -> vector<16x8xf32>
    %c0_11 = arith.constant 0 : index
    %c0_12 = arith.constant 0 : index
    %c0_13 = arith.constant 0 : index
    %c0_14 = arith.constant 0 : index
    %7 = vector.load %arg4[%c0_11, %c0_12, %c0_13, %c0_14] : memref<3x4x1x8xf32, #tpu.memory_space<vmem>>, vector<1x1x1x8xf32>
    %8 = vector.shape_cast %7 : vector<1x1x1x8xf32> to vector<1x8xf32>
    %9 = vector.broadcast %8 : vector<1x8xf32> to vector<16x8xf32>
    %10 = arith.addf %6, %9 : vector<16x8xf32>
    %c1 = arith.constant 1 : index
    %c0_15 = arith.constant 0 : index
    %c0_16 = arith.constant 0 : index
    %c0_17 = arith.constant 0 : index
    %11 = vector.load %arg3[%c1, %c0_15, %c0_16, %c0_17] : memref<3x4x32x8xf32, #tpu.memory_space<vmem>>, vector<1x1x32x8xf32>
    %12 = vector.shape_cast %11 : vector<1x1x32x8xf32> to vector<32x8xf32>
    %cst_18 = arith.constant dense<0.000000e+00> : vector<16x8xf32>
    %13 = tpu.matmul %1, %12, %cst_18 {dimension_numbers = #tpu.dot_dimension_numbers<[1], [0], [0], [1], [0, 0, 1, 1], [], []>} : vector<16x32xf32>, vector<32x8xf32>, vector<16x8xf32> -> vector<16x8xf32>
    %c1_19 = arith.constant 1 : index
    %c0_20 = arith.constant 0 : index
    %c0_21 = arith.constant 0 : index
    %c0_22 = arith.constant 0 : index
    %14 = vector.load %arg4[%c1_19, %c0_20, %c0_21, %c0_22] : memref<3x4x1x8xf32, #tpu.memory_space<vmem>>, vector<1x1x1x8xf32>
    %15 = vector.shape_cast %14 : vector<1x1x1x8xf32> to vector<1x8xf32>
    %16 = vector.broadcast %15 : vector<1x8xf32> to vector<16x8xf32>
    %17 = arith.addf %13, %16 : vector<16x8xf32>
    %c2 = arith.constant 2 : index
    %c0_23 = arith.constant 0 : index
    %c0_24 = arith.constant 0 : index
    %c0_25 = arith.constant 0 : index
    %18 = vector.load %arg3[%c2, %c0_23, %c0_24, %c0_25] : memref<3x4x32x8xf32, #tpu.memory_space<vmem>>, vector<1x1x32x8xf32>
    %19 = vector.shape_cast %18 : vector<1x1x32x8xf32> to vector<32x8xf32>
    %cst_26 = arith.constant dense<0.000000e+00> : vector<16x8xf32>
    %20 = tpu.matmul %2, %19, %cst_26 {dimension_numbers = #tpu.dot_dimension_numbers<[1], [0], [0], [1], [0, 0, 1, 1], [], []>} : vector<16x32xf32>, vector<32x8xf32>, vector<16x8xf32> -> vector<16x8xf32>
    %c2_27 = arith.constant 2 : index
    %c0_28 = arith.constant 0 : index
    %c0_29 = arith.constant 0 : index
    %c0_30 = arith.constant 0 : index
    %21 = vector.load %arg4[%c2_27, %c0_28, %c0_29, %c0_30] : memref<3x4x1x8xf32, #tpu.memory_space<vmem>>, vector<1x1x1x8xf32>
    %22 = vector.shape_cast %21 : vector<1x1x1x8xf32> to vector<1x8xf32>
    %23 = vector.broadcast %22 : vector<1x8xf32> to vector<16x8xf32>
    %24 = arith.addf %20, %23 : vector<16x8xf32>
    %c0_31 = arith.constant 0 : index
    %c0_32 = arith.constant 0 : index
    %c0_33 = arith.constant 0 : index
    %25 = vector.load %arg5[%c0_31, %c0_32, %c0_33] : memref<4x8x32xf32, #tpu.memory_space<vmem>>, vector<1x8x32xf32>
    %26 = vector.shape_cast %25 : vector<1x8x32xf32> to vector<8x32xf32>
    %27 = vector.extract_strided_slice %10 {offsets = [0, 0], sizes = [8, 8], strides = [1, 1]} : vector<16x8xf32> to vector<8x8xf32>
    %28 = vector.extract_strided_slice %17 {offsets = [0, 0], sizes = [8, 8], strides = [1, 1]} : vector<16x8xf32> to vector<8x8xf32>
    %29 = vector.extract_strided_slice %24 {offsets = [0, 0], sizes = [8, 8], strides = [1, 1]} : vector<16x8xf32> to vector<8x8xf32>
    %30 = tpu.transpose %28, [1, 0] : vector<8x8xf32> -> vector<8x8xf32>
    %cst_34 = arith.constant dense<0.000000e+00> : vector<8x8xf32>
    %31 = tpu.matmul %27, %30, %cst_34 {dimension_numbers = #tpu.dot_dimension_numbers<[1], [0], [0], [1], [0, 0, 1, 1], [], []>} : vector<8x8xf32>, vector<8x8xf32>, vector<8x8xf32> -> vector<8x8xf32>
    %32 = arith.mulf %27, %27 : vector<8x8xf32>
    %cst_35 = arith.constant dense<0.000000e+00> : vector<8xf32>
    %33 = vector.multi_reduction <add>, %32, %cst_35 [1] : vector<8x8xf32> to vector<8xf32>
    %34 = vector.shape_cast %33 : vector<8xf32> to vector<8x1xf32>
    %35 = arith.mulf %28, %28 : vector<8x8xf32>
    %cst_36 = arith.constant dense<0.000000e+00> : vector<8xf32>
    %36 = vector.multi_reduction <add>, %35, %cst_36 [1] : vector<8x8xf32> to vector<8xf32>
    %37 = vector.shape_cast %36 : vector<8xf32> to vector<8x1xf32>
    %38 = tpu.transpose %37, [1, 0] : vector<8x1xf32> -> vector<1x8xf32>
    %cst_37 = arith.constant 2.000000e+00 : f32
    %39 = vector.broadcast %cst_37 : f32 to vector<8x8xf32>
    %40 = arith.mulf %39, %31 : vector<8x8xf32>
    %cst_38 = arith.constant 1.000000e+00 : f32
    %41 = vector.broadcast %cst_38 : f32 to vector<8x8xf32>
    %42 = arith.subf %41, %40 : vector<8x8xf32>
    %cst_39 = arith.constant 1.000000e+00 : f32
    %43 = vector.broadcast %cst_39 : f32 to vector<1x8xf32>
    %44 = arith.mulf %43, %38 : vector<1x8xf32>
    %45 = vector.broadcast %44 : vector<1x8xf32> to vector<8x8xf32>
    %46 = arith.addf %42, %45 : vector<8x8xf32>
    %cst_40 = arith.constant 1.000000e+00 : f32
    %47 = vector.broadcast %cst_40 : f32 to vector<8x1xf32>
    %48 = arith.mulf %47, %34 : vector<8x1xf32>
    %cst_41 = arith.constant 1.000000e+00 : f32
    %49 = vector.broadcast %cst_41 : f32 to vector<8x1xf32>
    %50 = arith.subf %49, %48 : vector<8x1xf32>
    %cst_42 = arith.constant 2.000000e+00 : f32
    %51 = vector.broadcast %cst_42 : f32 to vector<8x8xf32>
    %52 = arith.mulf %51, %31 : vector<8x8xf32>
    %cst_43 = arith.constant 1.000000e+00 : f32
    %53 = vector.broadcast %cst_43 : f32 to vector<8x8xf32>
    %54 = arith.subf %53, %52 : vector<8x8xf32>
    %cst_44 = arith.constant 1.000000e+00 : f32
    %55 = vector.broadcast %cst_44 : f32 to vector<8x1xf32>
    %56 = arith.mulf %55, %34 : vector<8x1xf32>
    %57 = vector.broadcast %56 : vector<8x1xf32> to vector<8x8xf32>
    %58 = vector.broadcast %38 : vector<1x8xf32> to vector<8x8xf32>
    %59 = arith.mulf %57, %58 : vector<8x8xf32>
    %60 = arith.addf %54, %59 : vector<8x8xf32>
    %cst_45 = arith.constant 1.000000e-15 : f32
    %61 = vector.broadcast %cst_45 : f32 to vector<8x8xf32>
    %62 = arith.maximumf %60, %61 : vector<8x8xf32>
    %63 = arith.mulf %46, %46 : vector<8x8xf32>
    %64 = vector.broadcast %34 : vector<8x1xf32> to vector<8x8xf32>
    %65 = arith.mulf %63, %64 : vector<8x8xf32>
    %cst_46 = arith.constant 2.000000e+00 : f32
    %66 = vector.broadcast %cst_46 : f32 to vector<8x8xf32>
    %67 = arith.mulf %66, %46 : vector<8x8xf32>
    %68 = vector.broadcast %50 : vector<8x1xf32> to vector<8x8xf32>
    %69 = arith.mulf %67, %68 : vector<8x8xf32>
    %70 = arith.mulf %69, %31 : vector<8x8xf32>
    %71 = arith.subf %65, %70 : vector<8x8xf32>
    %72 = arith.mulf %50, %50 : vector<8x1xf32>
    %73 = vector.broadcast %72 : vector<8x1xf32> to vector<8x8xf32>
    %74 = vector.broadcast %38 : vector<1x8xf32> to vector<8x8xf32>
    %75 = arith.mulf %73, %74 : vector<8x8xf32>
    %76 = arith.addf %71, %75 : vector<8x8xf32>
    %cst_47 = arith.constant 0.000000e+00 : f32
    %77 = vector.broadcast %cst_47 : f32 to vector<8x8xf32>
    %78 = arith.maximumf %76, %77 : vector<8x8xf32>
    %79 = math.sqrt %78 : vector<8x8xf32>
    %80 = arith.divf %79, %62 : vector<8x8xf32>
    %cst_48 = arith.constant 1.000000e+00 : f32
    %81 = vector.broadcast %cst_48 : f32 to vector<8x8xf32>
    %82 = arith.mulf %81, %80 : vector<8x8xf32>
    %cst_49 = arith.constant -0.99999988 : f32
    %cst_50 = arith.constant 0.99999988 : f32
    %83 = vector.broadcast %cst_49 : f32 to vector<8x8xf32>
    %84 = arith.maximumf %83, %82 : vector<8x8xf32>
    %85 = vector.broadcast %cst_50 : f32 to vector<8x8xf32>
    %86 = arith.minimumf %85, %84 : vector<8x8xf32>
    %cst_51 = arith.constant 1.000000e+00 : f32
    %87 = vector.broadcast %cst_51 : f32 to vector<8x8xf32>
    %88 = arith.addf %87, %86 : vector<8x8xf32>
    %cst_52 = arith.constant 1.000000e+00 : f32
    %89 = vector.broadcast %cst_52 : f32 to vector<8x8xf32>
    %90 = arith.subf %89, %86 : vector<8x8xf32>
    %91 = tpu.reciprocal %90 : vector<8x8xf32> -> vector<8x8xf32>
    %92 = arith.mulf %88, %91 : vector<8x8xf32>
    %93 = math.log %92 : vector<8x8xf32>
    %cst_53 = arith.constant 1.000000e+00 : f32
    %94 = vector.broadcast %cst_53 : f32 to vector<8x8xf32>
    %95 = arith.mulf %94, %93 : vector<8x8xf32>
    %cst_54 = arith.constant 0.000000e+00 : f32
    %96 = vector.broadcast %cst_54 : f32 to vector<8x8xf32>
    %97 = arith.subf %96, %95 : vector<8x8xf32>
    %98 = math.exp %97 : vector<8x8xf32>
    %cst_55 = arith.constant dense<0.000000e+00> : vector<8xf32>
    %99 = vector.multi_reduction <add>, %98, %cst_55 [1] : vector<8x8xf32> to vector<8xf32>
    %100 = vector.shape_cast %99 : vector<8xf32> to vector<8x1xf32>
    %101 = tpu.reciprocal %100 : vector<8x1xf32> -> vector<8x1xf32>
    %102 = vector.broadcast %101 : vector<8x1xf32> to vector<8x8xf32>
    %103 = arith.mulf %98, %102 : vector<8x8xf32>
    %c0_56 = arith.constant 0 : index
    %c0_57 = arith.constant 0 : index
    %c0_58 = arith.constant 0 : index
    %c0_59 = arith.constant 0 : index
    %104 = vector.load %arg8[%c0_56, %c0_57, %c0_58, %c0_59] : memref<2x4x8x8xf32, #tpu.memory_space<vmem>>, vector<1x1x8x8xf32>
    %105 = vector.shape_cast %104 : vector<1x1x8x8xf32> to vector<8x8xf32>
    %106 = vector.shape_cast %103 : vector<8x8xf32> to vector<1x1x8x8xf32>
    tpu.vector_store %arg8[%c0_56, %c0_57, %c0_58, %c0_59], %106 {strides = array<i32>} : memref<2x4x8x8xf32, #tpu.memory_space<vmem>>, vector<1x1x8x8xf32>,
    %cst_60 = arith.constant dense<0.000000e+00> : vector<8x8xf32>
    %107 = tpu.matmul %103, %29, %cst_60 {dimension_numbers = #tpu.dot_dimension_numbers<[1], [0], [0], [1], [0, 0, 1, 1], [], []>} : vector<8x8xf32>, vector<8x8xf32>, vector<8x8xf32> -> vector<8x8xf32>
    %cst_61 = arith.constant dense<0.000000e+00> : vector<8x32xf32>
    %108 = tpu.matmul %107, %26, %cst_61 {dimension_numbers = #tpu.dot_dimension_numbers<[1], [0], [0], [1], [0, 0, 1, 1], [], []>} : vector<8x8xf32>, vector<8x32xf32>, vector<8x32xf32> -> vector<8x32xf32>
    %109 = vector.extract_strided_slice %10 {offsets = [8, 0], sizes = [8, 8], strides = [1, 1]} : vector<16x8xf32> to vector<8x8xf32>
    %110 = vector.extract_strided_slice %17 {offsets = [8, 0], sizes = [8, 8], strides = [1, 1]} : vector<16x8xf32> to vector<8x8xf32>
    %111 = vector.extract_strided_slice %24 {offsets = [8, 0], sizes = [8, 8], strides = [1, 1]} : vector<16x8xf32> to vector<8x8xf32>
    %112 = tpu.transpose %110, [1, 0] : vector<8x8xf32> -> vector<8x8xf32>
    %cst_62 = arith.constant dense<0.000000e+00> : vector<8x8xf32>
    %113 = tpu.matmul %109, %112, %cst_62 {dimension_numbers = #tpu.dot_dimension_numbers<[1], [0], [0], [1], [0, 0, 1, 1], [], []>} : vector<8x8xf32>, vector<8x8xf32>, vector<8x8xf32> -> vector<8x8xf32>
    %114 = arith.mulf %109, %109 : vector<8x8xf32>
    %cst_63 = arith.constant dense<0.000000e+00> : vector<8xf32>
    %115 = vector.multi_reduction <add>, %114, %cst_63 [1] : vector<8x8xf32> to vector<8xf32>
    %116 = vector.shape_cast %115 : vector<8xf32> to vector<8x1xf32>
    %117 = arith.mulf %110, %110 : vector<8x8xf32>
    %cst_64 = arith.constant dense<0.000000e+00> : vector<8xf32>
    %118 = vector.multi_reduction <add>, %117, %cst_64 [1] : vector<8x8xf32> to vector<8xf32>
    %119 = vector.shape_cast %118 : vector<8xf32> to vector<8x1xf32>
    %120 = tpu.transpose %119, [1, 0] : vector<8x1xf32> -> vector<1x8xf32>
    %cst_65 = arith.constant 2.000000e+00 : f32
    %121 = vector.broadcast %cst_65 : f32 to vector<8x8xf32>
    %122 = arith.mulf %121, %113 : vector<8x8xf32>
    %cst_66 = arith.constant 1.000000e+00 : f32
    %123 = vector.broadcast %cst_66 : f32 to vector<8x8xf32>
    %124 = arith.subf %123, %122 : vector<8x8xf32>
    %cst_67 = arith.constant 1.000000e+00 : f32
    %125 = vector.broadcast %cst_67 : f32 to vector<1x8xf32>
    %126 = arith.mulf %125, %120 : vector<1x8xf32>
    %127 = vector.broadcast %126 : vector<1x8xf32> to vector<8x8xf32>
    %128 = arith.addf %124, %127 : vector<8x8xf32>
    %cst_68 = arith.constant 1.000000e+00 : f32
    %129 = vector.broadcast %cst_68 : f32 to vector<8x1xf32>
    %130 = arith.mulf %129, %116 : vector<8x1xf32>
    %cst_69 = arith.constant 1.000000e+00 : f32
    %131 = vector.broadcast %cst_69 : f32 to vector<8x1xf32>
    %132 = arith.subf %131, %130 : vector<8x1xf32>
    %cst_70 = arith.constant 2.000000e+00 : f32
    %133 = vector.broadcast %cst_70 : f32 to vector<8x8xf32>
    %134 = arith.mulf %133, %113 : vector<8x8xf32>
    %cst_71 = arith.constant 1.000000e+00 : f32
    %135 = vector.broadcast %cst_71 : f32 to vector<8x8xf32>
    %136 = arith.subf %135, %134 : vector<8x8xf32>
    %cst_72 = arith.constant 1.000000e+00 : f32
    %137 = vector.broadcast %cst_72 : f32 to vector<8x1xf32>
    %138 = arith.mulf %137, %116 : vector<8x1xf32>
    %139 = vector.broadcast %138 : vector<8x1xf32> to vector<8x8xf32>
    %140 = vector.broadcast %120 : vector<1x8xf32> to vector<8x8xf32>
    %141 = arith.mulf %139, %140 : vector<8x8xf32>
    %142 = arith.addf %136, %141 : vector<8x8xf32>
    %cst_73 = arith.constant 1.000000e-15 : f32
    %143 = vector.broadcast %cst_73 : f32 to vector<8x8xf32>
    %144 = arith.maximumf %142, %143 : vector<8x8xf32>
    %145 = arith.mulf %128, %128 : vector<8x8xf32>
    %146 = vector.broadcast %116 : vector<8x1xf32> to vector<8x8xf32>
    %147 = arith.mulf %145, %146 : vector<8x8xf32>
    %cst_74 = arith.constant 2.000000e+00 : f32
    %148 = vector.broadcast %cst_74 : f32 to vector<8x8xf32>
    %149 = arith.mulf %148, %128 : vector<8x8xf32>
    %150 = vector.broadcast %132 : vector<8x1xf32> to vector<8x8xf32>
    %151 = arith.mulf %149, %150 : vector<8x8xf32>
    %152 = arith.mulf %151, %113 : vector<8x8xf32>
    %153 = arith.subf %147, %152 : vector<8x8xf32>
    %154 = arith.mulf %132, %132 : vector<8x1xf32>
    %155 = vector.broadcast %154 : vector<8x1xf32> to vector<8x8xf32>
    %156 = vector.broadcast %120 : vector<1x8xf32> to vector<8x8xf32>
    %157 = arith.mulf %155, %156 : vector<8x8xf32>
    %158 = arith.addf %153, %157 : vector<8x8xf32>
    %cst_75 = arith.constant 0.000000e+00 : f32
    %159 = vector.broadcast %cst_75 : f32 to vector<8x8xf32>
    %160 = arith.maximumf %158, %159 : vector<8x8xf32>
    %161 = math.sqrt %160 : vector<8x8xf32>
    %162 = arith.divf %161, %144 : vector<8x8xf32>
    %cst_76 = arith.constant 1.000000e+00 : f32
    %163 = vector.broadcast %cst_76 : f32 to vector<8x8xf32>
    %164 = arith.mulf %163, %162 : vector<8x8xf32>
    %cst_77 = arith.constant -0.99999988 : f32
    %cst_78 = arith.constant 0.99999988 : f32
    %165 = vector.broadcast %cst_77 : f32 to vector<8x8xf32>
    %166 = arith.maximumf %165, %164 : vector<8x8xf32>
    %167 = vector.broadcast %cst_78 : f32 to vector<8x8xf32>
    %168 = arith.minimumf %167, %166 : vector<8x8xf32>
    %cst_79 = arith.constant 1.000000e+00 : f32
    %169 = vector.broadcast %cst_79 : f32 to vector<8x8xf32>
    %170 = arith.addf %169, %168 : vector<8x8xf32>
    %cst_80 = arith.constant 1.000000e+00 : f32
    %171 = vector.broadcast %cst_80 : f32 to vector<8x8xf32>
    %172 = arith.subf %171, %168 : vector<8x8xf32>
    %173 = tpu.reciprocal %172 : vector<8x8xf32> -> vector<8x8xf32>
    %174 = arith.mulf %170, %173 : vector<8x8xf32>
    %175 = math.log %174 : vector<8x8xf32>
    %cst_81 = arith.constant 1.000000e+00 : f32
    %176 = vector.broadcast %cst_81 : f32 to vector<8x8xf32>
    %177 = arith.mulf %176, %175 : vector<8x8xf32>
    %cst_82 = arith.constant 0.000000e+00 : f32
    %178 = vector.broadcast %cst_82 : f32 to vector<8x8xf32>
    %179 = arith.subf %178, %177 : vector<8x8xf32>
    %180 = math.exp %179 : vector<8x8xf32>
    %cst_83 = arith.constant dense<0.000000e+00> : vector<8xf32>
    %181 = vector.multi_reduction <add>, %180, %cst_83 [1] : vector<8x8xf32> to vector<8xf32>
    %182 = vector.shape_cast %181 : vector<8xf32> to vector<8x1xf32>
    %183 = tpu.reciprocal %182 : vector<8x1xf32> -> vector<8x1xf32>
    %184 = vector.broadcast %183 : vector<8x1xf32> to vector<8x8xf32>
    %185 = arith.mulf %180, %184 : vector<8x8xf32>
    %c1_84 = arith.constant 1 : index
    %c0_85 = arith.constant 0 : index
    %c0_86 = arith.constant 0 : index
    %c0_87 = arith.constant 0 : index
    %186 = vector.load %arg8[%c1_84, %c0_85, %c0_86, %c0_87] : memref<2x4x8x8xf32, #tpu.memory_space<vmem>>, vector<1x1x8x8xf32>
    %187 = vector.shape_cast %186 : vector<1x1x8x8xf32> to vector<8x8xf32>
    %188 = vector.shape_cast %185 : vector<8x8xf32> to vector<1x1x8x8xf32>
    tpu.vector_store %arg8[%c1_84, %c0_85, %c0_86, %c0_87], %188 {strides = array<i32>} : memref<2x4x8x8xf32, #tpu.memory_space<vmem>>, vector<1x1x8x8xf32>,
    %cst_88 = arith.constant dense<0.000000e+00> : vector<8x8xf32>
    %189 = tpu.matmul %185, %111, %cst_88 {dimension_numbers = #tpu.dot_dimension_numbers<[1], [0], [0], [1], [0, 0, 1, 1], [], []>} : vector<8x8xf32>, vector<8x8xf32>, vector<8x8xf32> -> vector<8x8xf32>
    %cst_89 = arith.constant dense<0.000000e+00> : vector<8x32xf32>
    %190 = tpu.matmul %189, %26, %cst_89 {dimension_numbers = #tpu.dot_dimension_numbers<[1], [0], [0], [1], [0, 0, 1, 1], [], []>} : vector<8x8xf32>, vector<8x32xf32>, vector<8x32xf32> -> vector<8x32xf32>
    %c0_90 = arith.constant 0 : index
    %c1_91 = arith.constant 1 : index
    %c0_92 = arith.constant 0 : index
    %c0_93 = arith.constant 0 : index
    %191 = vector.load %arg3[%c0_90, %c1_91, %c0_92, %c0_93] : memref<3x4x32x8xf32, #tpu.memory_space<vmem>>, vector<1x1x32x8xf32>
    %192 = vector.shape_cast %191 : vector<1x1x32x8xf32> to vector<32x8xf32>
    %cst_94 = arith.constant dense<0.000000e+00> : vector<16x8xf32>
    %193 = tpu.matmul %0, %192, %cst_94 {dimension_numbers = #tpu.dot_dimension_numbers<[1], [0], [0], [1], [0, 0, 1, 1], [], []>} : vector<16x32xf32>, vector<32x8xf32>, vector<16x8xf32> -> vector<16x8xf32>
    %c0_95 = arith.constant 0 : index
    %c1_96 = arith.constant 1 : index
    %c0_97 = arith.constant 0 : index
    %c0_98 = arith.constant 0 : index
    %194 = vector.load %arg4[%c0_95, %c1_96, %c0_97, %c0_98] : memref<3x4x1x8xf32, #tpu.memory_space<vmem>>, vector<1x1x1x8xf32>
    %195 = vector.shape_cast %194 : vector<1x1x1x8xf32> to vector<1x8xf32>
    %196 = vector.broadcast %195 : vector<1x8xf32> to vector<16x8xf32>
    %197 = arith.addf %193, %196 : vector<16x8xf32>
    %c1_99 = arith.constant 1 : index
    %c1_100 = arith.constant 1 : index
    %c0_101 = arith.constant 0 : index
    %c0_102 = arith.constant 0 : index
    %198 = vector.load %arg3[%c1_99, %c1_100, %c0_101, %c0_102] : memref<3x4x32x8xf32, #tpu.memory_space<vmem>>, vector<1x1x32x8xf32>
    %199 = vector.shape_cast %198 : vector<1x1x32x8xf32> to vector<32x8xf32>
    %cst_103 = arith.constant dense<0.000000e+00> : vector<16x8xf32>
    %200 = tpu.matmul %1, %199, %cst_103 {dimension_numbers = #tpu.dot_dimension_numbers<[1], [0], [0], [1], [0, 0, 1, 1], [], []>} : vector<16x32xf32>, vector<32x8xf32>, vector<16x8xf32> -> vector<16x8xf32>
    %c1_104 = arith.constant 1 : index
    %c1_105 = arith.constant 1 : index
    %c0_106 = arith.constant 0 : index
    %c0_107 = arith.constant 0 : index
    %201 = vector.load %arg4[%c1_104, %c1_105, %c0_106, %c0_107] : memref<3x4x1x8xf32, #tpu.memory_space<vmem>>, vector<1x1x1x8xf32>
    %202 = vector.shape_cast %201 : vector<1x1x1x8xf32> to vector<1x8xf32>
    %203 = vector.broadcast %202 : vector<1x8xf32> to vector<16x8xf32>
    %204 = arith.addf %200, %203 : vector<16x8xf32>
    %c2_108 = arith.constant 2 : index
    %c1_109 = arith.constant 1 : index
    %c0_110 = arith.constant 0 : index
    %c0_111 = arith.constant 0 : index
    %205 = vector.load %arg3[%c2_108, %c1_109, %c0_110, %c0_111] : memref<3x4x32x8xf32, #tpu.memory_space<vmem>>, vector<1x1x32x8xf32>
    %206 = vector.shape_cast %205 : vector<1x1x32x8xf32> to vector<32x8xf32>
    %cst_112 = arith.constant dense<0.000000e+00> : vector<16x8xf32>
    %207 = tpu.matmul %2, %206, %cst_112 {dimension_numbers = #tpu.dot_dimension_numbers<[1], [0], [0], [1], [0, 0, 1, 1], [], []>} : vector<16x32xf32>, vector<32x8xf32>, vector<16x8xf32> -> vector<16x8xf32>
    %c2_113 = arith.constant 2 : index
    %c1_114 = arith.constant 1 : index
    %c0_115 = arith.constant 0 : index
    %c0_116 = arith.constant 0 : index
    %208 = vector.load %arg4[%c2_113, %c1_114, %c0_115, %c0_116] : memref<3x4x1x8xf32, #tpu.memory_space<vmem>>, vector<1x1x1x8xf32>
    %209 = vector.shape_cast %208 : vector<1x1x1x8xf32> to vector<1x8xf32>
    %210 = vector.broadcast %209 : vector<1x8xf32> to vector<16x8xf32>
    %211 = arith.addf %207, %210 : vector<16x8xf32>
    %c1_117 = arith.constant 1 : index
    %c0_118 = arith.constant 0 : index
    %c0_119 = arith.constant 0 : index
    %212 = vector.load %arg5[%c1_117, %c0_118, %c0_119] : memref<4x8x32xf32, #tpu.memory_space<vmem>>, vector<1x8x32xf32>
    %213 = vector.shape_cast %212 : vector<1x8x32xf32> to vector<8x32xf32>
    %214 = vector.extract_strided_slice %197 {offsets = [0, 0], sizes = [8, 8], strides = [1, 1]} : vector<16x8xf32> to vector<8x8xf32>
    %215 = vector.extract_strided_slice %204 {offsets = [0, 0], sizes = [8, 8], strides = [1, 1]} : vector<16x8xf32> to vector<8x8xf32>
    %216 = vector.extract_strided_slice %211 {offsets = [0, 0], sizes = [8, 8], strides = [1, 1]} : vector<16x8xf32> to vector<8x8xf32>
    %217 = tpu.transpose %215, [1, 0] : vector<8x8xf32> -> vector<8x8xf32>
    %cst_120 = arith.constant dense<0.000000e+00> : vector<8x8xf32>
    %218 = tpu.matmul %214, %217, %cst_120 {dimension_numbers = #tpu.dot_dimension_numbers<[1], [0], [0], [1], [0, 0, 1, 1], [], []>} : vector<8x8xf32>, vector<8x8xf32>, vector<8x8xf32> -> vector<8x8xf32>
    %219 = arith.mulf %214, %214 : vector<8x8xf32>
    %cst_121 = arith.constant dense<0.000000e+00> : vector<8xf32>
    %220 = vector.multi_reduction <add>, %219, %cst_121 [1] : vector<8x8xf32> to vector<8xf32>
    %221 = vector.shape_cast %220 : vector<8xf32> to vector<8x1xf32>
    %222 = arith.mulf %215, %215 : vector<8x8xf32>
    %cst_122 = arith.constant dense<0.000000e+00> : vector<8xf32>
    %223 = vector.multi_reduction <add>, %222, %cst_122 [1] : vector<8x8xf32> to vector<8xf32>
    %224 = vector.shape_cast %223 : vector<8xf32> to vector<8x1xf32>
    %225 = tpu.transpose %224, [1, 0] : vector<8x1xf32> -> vector<1x8xf32>
    %cst_123 = arith.constant 2.000000e+00 : f32
    %226 = vector.broadcast %cst_123 : f32 to vector<8x8xf32>
    %227 = arith.mulf %226, %218 : vector<8x8xf32>
    %cst_124 = arith.constant 1.000000e+00 : f32
    %228 = vector.broadcast %cst_124 : f32 to vector<8x8xf32>
    %229 = arith.subf %228, %227 : vector<8x8xf32>
    %cst_125 = arith.constant 1.000000e+00 : f32
    %230 = vector.broadcast %cst_125 : f32 to vector<1x8xf32>
    %231 = arith.mulf %230, %225 : vector<1x8xf32>
    %232 = vector.broadcast %231 : vector<1x8xf32> to vector<8x8xf32>
    %233 = arith.addf %229, %232 : vector<8x8xf32>
    %cst_126 = arith.constant 1.000000e+00 : f32
    %234 = vector.broadcast %cst_126 : f32 to vector<8x1xf32>
    %235 = arith.mulf %234, %221 : vector<8x1xf32>
    %cst_127 = arith.constant 1.000000e+00 : f32
    %236 = vector.broadcast %cst_127 : f32 to vector<8x1xf32>
    %237 = arith.subf %236, %235 : vector<8x1xf32>
    %cst_128 = arith.constant 2.000000e+00 : f32
    %238 = vector.broadcast %cst_128 : f32 to vector<8x8xf32>
    %239 = arith.mulf %238, %218 : vector<8x8xf32>
    %cst_129 = arith.constant 1.000000e+00 : f32
    %240 = vector.broadcast %cst_129 : f32 to vector<8x8xf32>
    %241 = arith.subf %240, %239 : vector<8x8xf32>
    %cst_130 = arith.constant 1.000000e+00 : f32
    %242 = vector.broadcast %cst_130 : f32 to vector<8x1xf32>
    %243 = arith.mulf %242, %221 : vector<8x1xf32>
    %244 = vector.broadcast %243 : vector<8x1xf32> to vector<8x8xf32>
    %245 = vector.broadcast %225 : vector<1x8xf32> to vector<8x8xf32>
    %246 = arith.mulf %244, %245 : vector<8x8xf32>
    %247 = arith.addf %241, %246 : vector<8x8xf32>
    %cst_131 = arith.constant 1.000000e-15 : f32
    %248 = vector.broadcast %cst_131 : f32 to vector<8x8xf32>
    %249 = arith.maximumf %247, %248 : vector<8x8xf32>
    %250 = arith.mulf %233, %233 : vector<8x8xf32>
    %251 = vector.broadcast %221 : vector<8x1xf32> to vector<8x8xf32>
    %252 = arith.mulf %250, %251 : vector<8x8xf32>
    %cst_132 = arith.constant 2.000000e+00 : f32
    %253 = vector.broadcast %cst_132 : f32 to vector<8x8xf32>
    %254 = arith.mulf %253, %233 : vector<8x8xf32>
    %255 = vector.broadcast %237 : vector<8x1xf32> to vector<8x8xf32>
    %256 = arith.mulf %254, %255 : vector<8x8xf32>
    %257 = arith.mulf %256, %218 : vector<8x8xf32>
    %258 = arith.subf %252, %257 : vector<8x8xf32>
    %259 = arith.mulf %237, %237 : vector<8x1xf32>
    %260 = vector.broadcast %259 : vector<8x1xf32> to vector<8x8xf32>
    %261 = vector.broadcast %225 : vector<1x8xf32> to vector<8x8xf32>
    %262 = arith.mulf %260, %261 : vector<8x8xf32>
    %263 = arith.addf %258, %262 : vector<8x8xf32>
    %cst_133 = arith.constant 0.000000e+00 : f32
    %264 = vector.broadcast %cst_133 : f32 to vector<8x8xf32>
    %265 = arith.maximumf %263, %264 : vector<8x8xf32>
    %266 = math.sqrt %265 : vector<8x8xf32>
    %267 = arith.divf %266, %249 : vector<8x8xf32>
    %cst_134 = arith.constant 1.000000e+00 : f32
    %268 = vector.broadcast %cst_134 : f32 to vector<8x8xf32>
    %269 = arith.mulf %268, %267 : vector<8x8xf32>
    %cst_135 = arith.constant -0.99999988 : f32
    %cst_136 = arith.constant 0.99999988 : f32
    %270 = vector.broadcast %cst_135 : f32 to vector<8x8xf32>
    %271 = arith.maximumf %270, %269 : vector<8x8xf32>
    %272 = vector.broadcast %cst_136 : f32 to vector<8x8xf32>
    %273 = arith.minimumf %272, %271 : vector<8x8xf32>
    %cst_137 = arith.constant 1.000000e+00 : f32
    %274 = vector.broadcast %cst_137 : f32 to vector<8x8xf32>
    %275 = arith.addf %274, %273 : vector<8x8xf32>
    %cst_138 = arith.constant 1.000000e+00 : f32
    %276 = vector.broadcast %cst_138 : f32 to vector<8x8xf32>
    %277 = arith.subf %276, %273 : vector<8x8xf32>
    %278 = tpu.reciprocal %277 : vector<8x8xf32> -> vector<8x8xf32>
    %279 = arith.mulf %275, %278 : vector<8x8xf32>
    %280 = math.log %279 : vector<8x8xf32>
    %cst_139 = arith.constant 1.000000e+00 : f32
    %281 = vector.broadcast %cst_139 : f32 to vector<8x8xf32>
    %282 = arith.mulf %281, %280 : vector<8x8xf32>
    %cst_140 = arith.constant 0.000000e+00 : f32
    %283 = vector.broadcast %cst_140 : f32 to vector<8x8xf32>
    %284 = arith.subf %283, %282 : vector<8x8xf32>
    %285 = math.exp %284 : vector<8x8xf32>
    %cst_141 = arith.constant dense<0.000000e+00> : vector<8xf32>
    %286 = vector.multi_reduction <add>, %285, %cst_141 [1] : vector<8x8xf32> to vector<8xf32>
    %287 = vector.shape_cast %286 : vector<8xf32> to vector<8x1xf32>
    %288 = tpu.reciprocal %287 : vector<8x1xf32> -> vector<8x1xf32>
    %289 = vector.broadcast %288 : vector<8x1xf32> to vector<8x8xf32>
    %290 = arith.mulf %285, %289 : vector<8x8xf32>
    %c0_142 = arith.constant 0 : index
    %c1_143 = arith.constant 1 : index
    %c0_144 = arith.constant 0 : index
    %c0_145 = arith.constant 0 : index
    %291 = vector.load %arg8[%c0_142, %c1_143, %c0_144, %c0_145] : memref<2x4x8x8xf32, #tpu.memory_space<vmem>>, vector<1x1x8x8xf32>
    %292 = vector.shape_cast %291 : vector<1x1x8x8xf32> to vector<8x8xf32>
    %293 = vector.shape_cast %290 : vector<8x8xf32> to vector<1x1x8x8xf32>
    tpu.vector_store %arg8[%c0_142, %c1_143, %c0_144, %c0_145], %293 {strides = array<i32>} : memref<2x4x8x8xf32, #tpu.memory_space<vmem>>, vector<1x1x8x8xf32>,
    %cst_146 = arith.constant dense<0.000000e+00> : vector<8x8xf32>
    %294 = tpu.matmul %290, %216, %cst_146 {dimension_numbers = #tpu.dot_dimension_numbers<[1], [0], [0], [1], [0, 0, 1, 1], [], []>} : vector<8x8xf32>, vector<8x8xf32>, vector<8x8xf32> -> vector<8x8xf32>
    %cst_147 = arith.constant dense<0.000000e+00> : vector<8x32xf32>
    %295 = tpu.matmul %294, %213, %cst_147 {dimension_numbers = #tpu.dot_dimension_numbers<[1], [0], [0], [1], [0, 0, 1, 1], [], []>} : vector<8x8xf32>, vector<8x32xf32>, vector<8x32xf32> -> vector<8x32xf32>
    %296 = arith.addf %108, %295 : vector<8x32xf32>
    %297 = vector.extract_strided_slice %197 {offsets = [8, 0], sizes = [8, 8], strides = [1, 1]} : vector<16x8xf32> to vector<8x8xf32>
    %298 = vector.extract_strided_slice %204 {offsets = [8, 0], sizes = [8, 8], strides = [1, 1]} : vector<16x8xf32> to vector<8x8xf32>
    %299 = vector.extract_strided_slice %211 {offsets = [8, 0], sizes = [8, 8], strides = [1, 1]} : vector<16x8xf32> to vector<8x8xf32>
    %300 = tpu.transpose %298, [1, 0] : vector<8x8xf32> -> vector<8x8xf32>
    %cst_148 = arith.constant dense<0.000000e+00> : vector<8x8xf32>
    %301 = tpu.matmul %297, %300, %cst_148 {dimension_numbers = #tpu.dot_dimension_numbers<[1], [0], [0], [1], [0, 0, 1, 1], [], []>} : vector<8x8xf32>, vector<8x8xf32>, vector<8x8xf32> -> vector<8x8xf32>
    %302 = arith.mulf %297, %297 : vector<8x8xf32>
    %cst_149 = arith.constant dense<0.000000e+00> : vector<8xf32>
    %303 = vector.multi_reduction <add>, %302, %cst_149 [1] : vector<8x8xf32> to vector<8xf32>
    %304 = vector.shape_cast %303 : vector<8xf32> to vector<8x1xf32>
    %305 = arith.mulf %298, %298 : vector<8x8xf32>
    %cst_150 = arith.constant dense<0.000000e+00> : vector<8xf32>
    %306 = vector.multi_reduction <add>, %305, %cst_150 [1] : vector<8x8xf32> to vector<8xf32>
    %307 = vector.shape_cast %306 : vector<8xf32> to vector<8x1xf32>
    %308 = tpu.transpose %307, [1, 0] : vector<8x1xf32> -> vector<1x8xf32>
    %cst_151 = arith.constant 2.000000e+00 : f32
    %309 = vector.broadcast %cst_151 : f32 to vector<8x8xf32>
    %310 = arith.mulf %309, %301 : vector<8x8xf32>
    %cst_152 = arith.constant 1.000000e+00 : f32
    %311 = vector.broadcast %cst_152 : f32 to vector<8x8xf32>
    %312 = arith.subf %311, %310 : vector<8x8xf32>
    %cst_153 = arith.constant 1.000000e+00 : f32
    %313 = vector.broadcast %cst_153 : f32 to vector<1x8xf32>
    %314 = arith.mulf %313, %308 : vector<1x8xf32>
    %315 = vector.broadcast %314 : vector<1x8xf32> to vector<8x8xf32>
    %316 = arith.addf %312, %315 : vector<8x8xf32>
    %cst_154 = arith.constant 1.000000e+00 : f32
    %317 = vector.broadcast %cst_154 : f32 to vector<8x1xf32>
    %318 = arith.mulf %317, %304 : vector<8x1xf32>
    %cst_155 = arith.constant 1.000000e+00 : f32
    %319 = vector.broadcast %cst_155 : f32 to vector<8x1xf32>
    %320 = arith.subf %319, %318 : vector<8x1xf32>
    %cst_156 = arith.constant 2.000000e+00 : f32
    %321 = vector.broadcast %cst_156 : f32 to vector<8x8xf32>
    %322 = arith.mulf %321, %301 : vector<8x8xf32>
    %cst_157 = arith.constant 1.000000e+00 : f32
    %323 = vector.broadcast %cst_157 : f32 to vector<8x8xf32>
    %324 = arith.subf %323, %322 : vector<8x8xf32>
    %cst_158 = arith.constant 1.000000e+00 : f32
    %325 = vector.broadcast %cst_158 : f32 to vector<8x1xf32>
    %326 = arith.mulf %325, %304 : vector<8x1xf32>
    %327 = vector.broadcast %326 : vector<8x1xf32> to vector<8x8xf32>
    %328 = vector.broadcast %308 : vector<1x8xf32> to vector<8x8xf32>
    %329 = arith.mulf %327, %328 : vector<8x8xf32>
    %330 = arith.addf %324, %329 : vector<8x8xf32>
    %cst_159 = arith.constant 1.000000e-15 : f32
    %331 = vector.broadcast %cst_159 : f32 to vector<8x8xf32>
    %332 = arith.maximumf %330, %331 : vector<8x8xf32>
    %333 = arith.mulf %316, %316 : vector<8x8xf32>
    %334 = vector.broadcast %304 : vector<8x1xf32> to vector<8x8xf32>
    %335 = arith.mulf %333, %334 : vector<8x8xf32>
    %cst_160 = arith.constant 2.000000e+00 : f32
    %336 = vector.broadcast %cst_160 : f32 to vector<8x8xf32>
    %337 = arith.mulf %336, %316 : vector<8x8xf32>
    %338 = vector.broadcast %320 : vector<8x1xf32> to vector<8x8xf32>
    %339 = arith.mulf %337, %338 : vector<8x8xf32>
    %340 = arith.mulf %339, %301 : vector<8x8xf32>
    %341 = arith.subf %335, %340 : vector<8x8xf32>
    %342 = arith.mulf %320, %320 : vector<8x1xf32>
    %343 = vector.broadcast %342 : vector<8x1xf32> to vector<8x8xf32>
    %344 = vector.broadcast %308 : vector<1x8xf32> to vector<8x8xf32>
    %345 = arith.mulf %343, %344 : vector<8x8xf32>
    %346 = arith.addf %341, %345 : vector<8x8xf32>
    %cst_161 = arith.constant 0.000000e+00 : f32
    %347 = vector.broadcast %cst_161 : f32 to vector<8x8xf32>
    %348 = arith.maximumf %346, %347 : vector<8x8xf32>
    %349 = math.sqrt %348 : vector<8x8xf32>
    %350 = arith.divf %349, %332 : vector<8x8xf32>
    %cst_162 = arith.constant 1.000000e+00 : f32
    %351 = vector.broadcast %cst_162 : f32 to vector<8x8xf32>
    %352 = arith.mulf %351, %350 : vector<8x8xf32>
    %cst_163 = arith.constant -0.99999988 : f32
    %cst_164 = arith.constant 0.99999988 : f32
    %353 = vector.broadcast %cst_163 : f32 to vector<8x8xf32>
    %354 = arith.maximumf %353, %352 : vector<8x8xf32>
    %355 = vector.broadcast %cst_164 : f32 to vector<8x8xf32>
    %356 = arith.minimumf %355, %354 : vector<8x8xf32>
    %cst_165 = arith.constant 1.000000e+00 : f32
    %357 = vector.broadcast %cst_165 : f32 to vector<8x8xf32>
    %358 = arith.addf %357, %356 : vector<8x8xf32>
    %cst_166 = arith.constant 1.000000e+00 : f32
    %359 = vector.broadcast %cst_166 : f32 to vector<8x8xf32>
    %360 = arith.subf %359, %356 : vector<8x8xf32>
    %361 = tpu.reciprocal %360 : vector<8x8xf32> -> vector<8x8xf32>
    %362 = arith.mulf %358, %361 : vector<8x8xf32>
    %363 = math.log %362 : vector<8x8xf32>
    %cst_167 = arith.constant 1.000000e+00 : f32
    %364 = vector.broadcast %cst_167 : f32 to vector<8x8xf32>
    %365 = arith.mulf %364, %363 : vector<8x8xf32>
    %cst_168 = arith.constant 0.000000e+00 : f32
    %366 = vector.broadcast %cst_168 : f32 to vector<8x8xf32>
    %367 = arith.subf %366, %365 : vector<8x8xf32>
    %368 = math.exp %367 : vector<8x8xf32>
    %cst_169 = arith.constant dense<0.000000e+00> : vector<8xf32>
    %369 = vector.multi_reduction <add>, %368, %cst_169 [1] : vector<8x8xf32> to vector<8xf32>
    %370 = vector.shape_cast %369 : vector<8xf32> to vector<8x1xf32>
    %371 = tpu.reciprocal %370 : vector<8x1xf32> -> vector<8x1xf32>
    %372 = vector.broadcast %371 : vector<8x1xf32> to vector<8x8xf32>
    %373 = arith.mulf %368, %372 : vector<8x8xf32>
    %c1_170 = arith.constant 1 : index
    %c1_171 = arith.constant 1 : index
    %c0_172 = arith.constant 0 : index
    %c0_173 = arith.constant 0 : index
    %374 = vector.load %arg8[%c1_170, %c1_171, %c0_172, %c0_173] : memref<2x4x8x8xf32, #tpu.memory_space<vmem>>, vector<1x1x8x8xf32>
    %375 = vector.shape_cast %374 : vector<1x1x8x8xf32> to vector<8x8xf32>
    %376 = vector.shape_cast %373 : vector<8x8xf32> to vector<1x1x8x8xf32>
    tpu.vector_store %arg8[%c1_170, %c1_171, %c0_172, %c0_173], %376 {strides = array<i32>} : memref<2x4x8x8xf32, #tpu.memory_space<vmem>>, vector<1x1x8x8xf32>,
    %cst_174 = arith.constant dense<0.000000e+00> : vector<8x8xf32>
    %377 = tpu.matmul %373, %299, %cst_174 {dimension_numbers = #tpu.dot_dimension_numbers<[1], [0], [0], [1], [0, 0, 1, 1], [], []>} : vector<8x8xf32>, vector<8x8xf32>, vector<8x8xf32> -> vector<8x8xf32>
    %cst_175 = arith.constant dense<0.000000e+00> : vector<8x32xf32>
    %378 = tpu.matmul %377, %213, %cst_175 {dimension_numbers = #tpu.dot_dimension_numbers<[1], [0], [0], [1], [0, 0, 1, 1], [], []>} : vector<8x8xf32>, vector<8x32xf32>, vector<8x32xf32> -> vector<8x32xf32>
    %379 = arith.addf %190, %378 : vector<8x32xf32>
    %c0_176 = arith.constant 0 : index
    %c2_177 = arith.constant 2 : index
    %c0_178 = arith.constant 0 : index
    %c0_179 = arith.constant 0 : index
    %380 = vector.load %arg3[%c0_176, %c2_177, %c0_178, %c0_179] : memref<3x4x32x8xf32, #tpu.memory_space<vmem>>, vector<1x1x32x8xf32>
    %381 = vector.shape_cast %380 : vector<1x1x32x8xf32> to vector<32x8xf32>
    %cst_180 = arith.constant dense<0.000000e+00> : vector<16x8xf32>
    %382 = tpu.matmul %0, %381, %cst_180 {dimension_numbers = #tpu.dot_dimension_numbers<[1], [0], [0], [1], [0, 0, 1, 1], [], []>} : vector<16x32xf32>, vector<32x8xf32>, vector<16x8xf32> -> vector<16x8xf32>
    %c0_181 = arith.constant 0 : index
    %c2_182 = arith.constant 2 : index
    %c0_183 = arith.constant 0 : index
    %c0_184 = arith.constant 0 : index
    %383 = vector.load %arg4[%c0_181, %c2_182, %c0_183, %c0_184] : memref<3x4x1x8xf32, #tpu.memory_space<vmem>>, vector<1x1x1x8xf32>
    %384 = vector.shape_cast %383 : vector<1x1x1x8xf32> to vector<1x8xf32>
    %385 = vector.broadcast %384 : vector<1x8xf32> to vector<16x8xf32>
    %386 = arith.addf %382, %385 : vector<16x8xf32>
    %c1_185 = arith.constant 1 : index
    %c2_186 = arith.constant 2 : index
    %c0_187 = arith.constant 0 : index
    %c0_188 = arith.constant 0 : index
    %387 = vector.load %arg3[%c1_185, %c2_186, %c0_187, %c0_188] : memref<3x4x32x8xf32, #tpu.memory_space<vmem>>, vector<1x1x32x8xf32>
    %388 = vector.shape_cast %387 : vector<1x1x32x8xf32> to vector<32x8xf32>
    %cst_189 = arith.constant dense<0.000000e+00> : vector<16x8xf32>
    %389 = tpu.matmul %1, %388, %cst_189 {dimension_numbers = #tpu.dot_dimension_numbers<[1], [0], [0], [1], [0, 0, 1, 1], [], []>} : vector<16x32xf32>, vector<32x8xf32>, vector<16x8xf32> -> vector<16x8xf32>
    %c1_190 = arith.constant 1 : index
    %c2_191 = arith.constant 2 : index
    %c0_192 = arith.constant 0 : index
    %c0_193 = arith.constant 0 : index
    %390 = vector.load %arg4[%c1_190, %c2_191, %c0_192, %c0_193] : memref<3x4x1x8xf32, #tpu.memory_space<vmem>>, vector<1x1x1x8xf32>
    %391 = vector.shape_cast %390 : vector<1x1x1x8xf32> to vector<1x8xf32>
    %392 = vector.broadcast %391 : vector<1x8xf32> to vector<16x8xf32>
    %393 = arith.addf %389, %392 : vector<16x8xf32>
    %c2_194 = arith.constant 2 : index
    %c2_195 = arith.constant 2 : index
    %c0_196 = arith.constant 0 : index
    %c0_197 = arith.constant 0 : index
    %394 = vector.load %arg3[%c2_194, %c2_195, %c0_196, %c0_197] : memref<3x4x32x8xf32, #tpu.memory_space<vmem>>, vector<1x1x32x8xf32>
    %395 = vector.shape_cast %394 : vector<1x1x32x8xf32> to vector<32x8xf32>
    %cst_198 = arith.constant dense<0.000000e+00> : vector<16x8xf32>
    %396 = tpu.matmul %2, %395, %cst_198 {dimension_numbers = #tpu.dot_dimension_numbers<[1], [0], [0], [1], [0, 0, 1, 1], [], []>} : vector<16x32xf32>, vector<32x8xf32>, vector<16x8xf32> -> vector<16x8xf32>
    %c2_199 = arith.constant 2 : index
    %c2_200 = arith.constant 2 : index
    %c0_201 = arith.constant 0 : index
    %c0_202 = arith.constant 0 : index
    %397 = vector.load %arg4[%c2_199, %c2_200, %c0_201, %c0_202] : memref<3x4x1x8xf32, #tpu.memory_space<vmem>>, vector<1x1x1x8xf32>
    %398 = vector.shape_cast %397 : vector<1x1x1x8xf32> to vector<1x8xf32>
    %399 = vector.broadcast %398 : vector<1x8xf32> to vector<16x8xf32>
    %400 = arith.addf %396, %399 : vector<16x8xf32>
    %c2_203 = arith.constant 2 : index
    %c0_204 = arith.constant 0 : index
    %c0_205 = arith.constant 0 : index
    %401 = vector.load %arg5[%c2_203, %c0_204, %c0_205] : memref<4x8x32xf32, #tpu.memory_space<vmem>>, vector<1x8x32xf32>
    %402 = vector.shape_cast %401 : vector<1x8x32xf32> to vector<8x32xf32>
    %403 = vector.extract_strided_slice %386 {offsets = [0, 0], sizes = [8, 8], strides = [1, 1]} : vector<16x8xf32> to vector<8x8xf32>
    %404 = vector.extract_strided_slice %393 {offsets = [0, 0], sizes = [8, 8], strides = [1, 1]} : vector<16x8xf32> to vector<8x8xf32>
    %405 = vector.extract_strided_slice %400 {offsets = [0, 0], sizes = [8, 8], strides = [1, 1]} : vector<16x8xf32> to vector<8x8xf32>
    %406 = tpu.transpose %404, [1, 0] : vector<8x8xf32> -> vector<8x8xf32>
    %cst_206 = arith.constant dense<0.000000e+00> : vector<8x8xf32>
    %407 = tpu.matmul %403, %406, %cst_206 {dimension_numbers = #tpu.dot_dimension_numbers<[1], [0], [0], [1], [0, 0, 1, 1], [], []>} : vector<8x8xf32>, vector<8x8xf32>, vector<8x8xf32> -> vector<8x8xf32>
    %408 = arith.mulf %403, %403 : vector<8x8xf32>
    %cst_207 = arith.constant dense<0.000000e+00> : vector<8xf32>
    %409 = vector.multi_reduction <add>, %408, %cst_207 [1] : vector<8x8xf32> to vector<8xf32>
    %410 = vector.shape_cast %409 : vector<8xf32> to vector<8x1xf32>
    %411 = arith.mulf %404, %404 : vector<8x8xf32>
    %cst_208 = arith.constant dense<0.000000e+00> : vector<8xf32>
    %412 = vector.multi_reduction <add>, %411, %cst_208 [1] : vector<8x8xf32> to vector<8xf32>
    %413 = vector.shape_cast %412 : vector<8xf32> to vector<8x1xf32>
    %414 = tpu.transpose %413, [1, 0] : vector<8x1xf32> -> vector<1x8xf32>
    %cst_209 = arith.constant 2.000000e+00 : f32
    %415 = vector.broadcast %cst_209 : f32 to vector<8x8xf32>
    %416 = arith.mulf %415, %407 : vector<8x8xf32>
    %cst_210 = arith.constant 1.000000e+00 : f32
    %417 = vector.broadcast %cst_210 : f32 to vector<8x8xf32>
    %418 = arith.subf %417, %416 : vector<8x8xf32>
    %cst_211 = arith.constant 1.000000e+00 : f32
    %419 = vector.broadcast %cst_211 : f32 to vector<1x8xf32>
    %420 = arith.mulf %419, %414 : vector<1x8xf32>
    %421 = vector.broadcast %420 : vector<1x8xf32> to vector<8x8xf32>
    %422 = arith.addf %418, %421 : vector<8x8xf32>
    %cst_212 = arith.constant 1.000000e+00 : f32
    %423 = vector.broadcast %cst_212 : f32 to vector<8x1xf32>
    %424 = arith.mulf %423, %410 : vector<8x1xf32>
    %cst_213 = arith.constant 1.000000e+00 : f32
    %425 = vector.broadcast %cst_213 : f32 to vector<8x1xf32>
    %426 = arith.subf %425, %424 : vector<8x1xf32>
    %cst_214 = arith.constant 2.000000e+00 : f32
    %427 = vector.broadcast %cst_214 : f32 to vector<8x8xf32>
    %428 = arith.mulf %427, %407 : vector<8x8xf32>
    %cst_215 = arith.constant 1.000000e+00 : f32
    %429 = vector.broadcast %cst_215 : f32 to vector<8x8xf32>
    %430 = arith.subf %429, %428 : vector<8x8xf32>
    %cst_216 = arith.constant 1.000000e+00 : f32
    %431 = vector.broadcast %cst_216 : f32 to vector<8x1xf32>
    %432 = arith.mulf %431, %410 : vector<8x1xf32>
    %433 = vector.broadcast %432 : vector<8x1xf32> to vector<8x8xf32>
    %434 = vector.broadcast %414 : vector<1x8xf32> to vector<8x8xf32>
    %435 = arith.mulf %433, %434 : vector<8x8xf32>
    %436 = arith.addf %430, %435 : vector<8x8xf32>
    %cst_217 = arith.constant 1.000000e-15 : f32
    %437 = vector.broadcast %cst_217 : f32 to vector<8x8xf32>
    %438 = arith.maximumf %436, %437 : vector<8x8xf32>
    %439 = arith.mulf %422, %422 : vector<8x8xf32>
    %440 = vector.broadcast %410 : vector<8x1xf32> to vector<8x8xf32>
    %441 = arith.mulf %439, %440 : vector<8x8xf32>
    %cst_218 = arith.constant 2.000000e+00 : f32
    %442 = vector.broadcast %cst_218 : f32 to vector<8x8xf32>
    %443 = arith.mulf %442, %422 : vector<8x8xf32>
    %444 = vector.broadcast %426 : vector<8x1xf32> to vector<8x8xf32>
    %445 = arith.mulf %443, %444 : vector<8x8xf32>
    %446 = arith.mulf %445, %407 : vector<8x8xf32>
    %447 = arith.subf %441, %446 : vector<8x8xf32>
    %448 = arith.mulf %426, %426 : vector<8x1xf32>
    %449 = vector.broadcast %448 : vector<8x1xf32> to vector<8x8xf32>
    %450 = vector.broadcast %414 : vector<1x8xf32> to vector<8x8xf32>
    %451 = arith.mulf %449, %450 : vector<8x8xf32>
    %452 = arith.addf %447, %451 : vector<8x8xf32>
    %cst_219 = arith.constant 0.000000e+00 : f32
    %453 = vector.broadcast %cst_219 : f32 to vector<8x8xf32>
    %454 = arith.maximumf %452, %453 : vector<8x8xf32>
    %455 = math.sqrt %454 : vector<8x8xf32>
    %456 = arith.divf %455, %438 : vector<8x8xf32>
    %cst_220 = arith.constant 1.000000e+00 : f32
    %457 = vector.broadcast %cst_220 : f32 to vector<8x8xf32>
    %458 = arith.mulf %457, %456 : vector<8x8xf32>
    %cst_221 = arith.constant -0.99999988 : f32
    %cst_222 = arith.constant 0.99999988 : f32
    %459 = vector.broadcast %cst_221 : f32 to vector<8x8xf32>
    %460 = arith.maximumf %459, %458 : vector<8x8xf32>
    %461 = vector.broadcast %cst_222 : f32 to vector<8x8xf32>
    %462 = arith.minimumf %461, %460 : vector<8x8xf32>
    %cst_223 = arith.constant 1.000000e+00 : f32
    %463 = vector.broadcast %cst_223 : f32 to vector<8x8xf32>
    %464 = arith.addf %463, %462 : vector<8x8xf32>
    %cst_224 = arith.constant 1.000000e+00 : f32
    %465 = vector.broadcast %cst_224 : f32 to vector<8x8xf32>
    %466 = arith.subf %465, %462 : vector<8x8xf32>
    %467 = tpu.reciprocal %466 : vector<8x8xf32> -> vector<8x8xf32>
    %468 = arith.mulf %464, %467 : vector<8x8xf32>
    %469 = math.log %468 : vector<8x8xf32>
    %cst_225 = arith.constant 1.000000e+00 : f32
    %470 = vector.broadcast %cst_225 : f32 to vector<8x8xf32>
    %471 = arith.mulf %470, %469 : vector<8x8xf32>
    %cst_226 = arith.constant 0.000000e+00 : f32
    %472 = vector.broadcast %cst_226 : f32 to vector<8x8xf32>
    %473 = arith.subf %472, %471 : vector<8x8xf32>
    %474 = math.exp %473 : vector<8x8xf32>
    %cst_227 = arith.constant dense<0.000000e+00> : vector<8xf32>
    %475 = vector.multi_reduction <add>, %474, %cst_227 [1] : vector<8x8xf32> to vector<8xf32>
    %476 = vector.shape_cast %475 : vector<8xf32> to vector<8x1xf32>
    %477 = tpu.reciprocal %476 : vector<8x1xf32> -> vector<8x1xf32>
    %478 = vector.broadcast %477 : vector<8x1xf32> to vector<8x8xf32>
    %479 = arith.mulf %474, %478 : vector<8x8xf32>
    %c0_228 = arith.constant 0 : index
    %c2_229 = arith.constant 2 : index
    %c0_230 = arith.constant 0 : index
    %c0_231 = arith.constant 0 : index
    %480 = vector.load %arg8[%c0_228, %c2_229, %c0_230, %c0_231] : memref<2x4x8x8xf32, #tpu.memory_space<vmem>>, vector<1x1x8x8xf32>
    %481 = vector.shape_cast %480 : vector<1x1x8x8xf32> to vector<8x8xf32>
    %482 = vector.shape_cast %479 : vector<8x8xf32> to vector<1x1x8x8xf32>
    tpu.vector_store %arg8[%c0_228, %c2_229, %c0_230, %c0_231], %482 {strides = array<i32>} : memref<2x4x8x8xf32, #tpu.memory_space<vmem>>, vector<1x1x8x8xf32>,
    %cst_232 = arith.constant dense<0.000000e+00> : vector<8x8xf32>
    %483 = tpu.matmul %479, %405, %cst_232 {dimension_numbers = #tpu.dot_dimension_numbers<[1], [0], [0], [1], [0, 0, 1, 1], [], []>} : vector<8x8xf32>, vector<8x8xf32>, vector<8x8xf32> -> vector<8x8xf32>
    %cst_233 = arith.constant dense<0.000000e+00> : vector<8x32xf32>
    %484 = tpu.matmul %483, %402, %cst_233 {dimension_numbers = #tpu.dot_dimension_numbers<[1], [0], [0], [1], [0, 0, 1, 1], [], []>} : vector<8x8xf32>, vector<8x32xf32>, vector<8x32xf32> -> vector<8x32xf32>
    %485 = arith.addf %296, %484 : vector<8x32xf32>
    %486 = vector.extract_strided_slice %386 {offsets = [8, 0], sizes = [8, 8], strides = [1, 1]} : vector<16x8xf32> to vector<8x8xf32>
    %487 = vector.extract_strided_slice %393 {offsets = [8, 0], sizes = [8, 8], strides = [1, 1]} : vector<16x8xf32> to vector<8x8xf32>
    %488 = vector.extract_strided_slice %400 {offsets = [8, 0], sizes = [8, 8], strides = [1, 1]} : vector<16x8xf32> to vector<8x8xf32>
    %489 = tpu.transpose %487, [1, 0] : vector<8x8xf32> -> vector<8x8xf32>
    %cst_234 = arith.constant dense<0.000000e+00> : vector<8x8xf32>
    %490 = tpu.matmul %486, %489, %cst_234 {dimension_numbers = #tpu.dot_dimension_numbers<[1], [0], [0], [1], [0, 0, 1, 1], [], []>} : vector<8x8xf32>, vector<8x8xf32>, vector<8x8xf32> -> vector<8x8xf32>
    %491 = arith.mulf %486, %486 : vector<8x8xf32>
    %cst_235 = arith.constant dense<0.000000e+00> : vector<8xf32>
    %492 = vector.multi_reduction <add>, %491, %cst_235 [1] : vector<8x8xf32> to vector<8xf32>
    %493 = vector.shape_cast %492 : vector<8xf32> to vector<8x1xf32>
    %494 = arith.mulf %487, %487 : vector<8x8xf32>
    %cst_236 = arith.constant dense<0.000000e+00> : vector<8xf32>
    %495 = vector.multi_reduction <add>, %494, %cst_236 [1] : vector<8x8xf32> to vector<8xf32>
    %496 = vector.shape_cast %495 : vector<8xf32> to vector<8x1xf32>
    %497 = tpu.transpose %496, [1, 0] : vector<8x1xf32> -> vector<1x8xf32>
    %cst_237 = arith.constant 2.000000e+00 : f32
    %498 = vector.broadcast %cst_237 : f32 to vector<8x8xf32>
    %499 = arith.mulf %498, %490 : vector<8x8xf32>
    %cst_238 = arith.constant 1.000000e+00 : f32
    %500 = vector.broadcast %cst_238 : f32 to vector<8x8xf32>
    %501 = arith.subf %500, %499 : vector<8x8xf32>
    %cst_239 = arith.constant 1.000000e+00 : f32
    %502 = vector.broadcast %cst_239 : f32 to vector<1x8xf32>
    %503 = arith.mulf %502, %497 : vector<1x8xf32>
    %504 = vector.broadcast %503 : vector<1x8xf32> to vector<8x8xf32>
    %505 = arith.addf %501, %504 : vector<8x8xf32>
    %cst_240 = arith.constant 1.000000e+00 : f32
    %506 = vector.broadcast %cst_240 : f32 to vector<8x1xf32>
    %507 = arith.mulf %506, %493 : vector<8x1xf32>
    %cst_241 = arith.constant 1.000000e+00 : f32
    %508 = vector.broadcast %cst_241 : f32 to vector<8x1xf32>
    %509 = arith.subf %508, %507 : vector<8x1xf32>
    %cst_242 = arith.constant 2.000000e+00 : f32
    %510 = vector.broadcast %cst_242 : f32 to vector<8x8xf32>
    %511 = arith.mulf %510, %490 : vector<8x8xf32>
    %cst_243 = arith.constant 1.000000e+00 : f32
    %512 = vector.broadcast %cst_243 : f32 to vector<8x8xf32>
    %513 = arith.subf %512, %511 : vector<8x8xf32>
    %cst_244 = arith.constant 1.000000e+00 : f32
    %514 = vector.broadcast %cst_244 : f32 to vector<8x1xf32>
    %515 = arith.mulf %514, %493 : vector<8x1xf32>
    %516 = vector.broadcast %515 : vector<8x1xf32> to vector<8x8xf32>
    %517 = vector.broadcast %497 : vector<1x8xf32> to vector<8x8xf32>
    %518 = arith.mulf %516, %517 : vector<8x8xf32>
    %519 = arith.addf %513, %518 : vector<8x8xf32>
    %cst_245 = arith.constant 1.000000e-15 : f32
    %520 = vector.broadcast %cst_245 : f32 to vector<8x8xf32>
    %521 = arith.maximumf %519, %520 : vector<8x8xf32>
    %522 = arith.mulf %505, %505 : vector<8x8xf32>
    %523 = vector.broadcast %493 : vector<8x1xf32> to vector<8x8xf32>
    %524 = arith.mulf %522, %523 : vector<8x8xf32>
    %cst_246 = arith.constant 2.000000e+00 : f32
    %525 = vector.broadcast %cst_246 : f32 to vector<8x8xf32>
    %526 = arith.mulf %525, %505 : vector<8x8xf32>
    %527 = vector.broadcast %509 : vector<8x1xf32> to vector<8x8xf32>
    %528 = arith.mulf %526, %527 : vector<8x8xf32>
    %529 = arith.mulf %528, %490 : vector<8x8xf32>
    %530 = arith.subf %524, %529 : vector<8x8xf32>
    %531 = arith.mulf %509, %509 : vector<8x1xf32>
    %532 = vector.broadcast %531 : vector<8x1xf32> to vector<8x8xf32>
    %533 = vector.broadcast %497 : vector<1x8xf32> to vector<8x8xf32>
    %534 = arith.mulf %532, %533 : vector<8x8xf32>
    %535 = arith.addf %530, %534 : vector<8x8xf32>
    %cst_247 = arith.constant 0.000000e+00 : f32
    %536 = vector.broadcast %cst_247 : f32 to vector<8x8xf32>
    %537 = arith.maximumf %535, %536 : vector<8x8xf32>
    %538 = math.sqrt %537 : vector<8x8xf32>
    %539 = arith.divf %538, %521 : vector<8x8xf32>
    %cst_248 = arith.constant 1.000000e+00 : f32
    %540 = vector.broadcast %cst_248 : f32 to vector<8x8xf32>
    %541 = arith.mulf %540, %539 : vector<8x8xf32>
    %cst_249 = arith.constant -0.99999988 : f32
    %cst_250 = arith.constant 0.99999988 : f32
    %542 = vector.broadcast %cst_249 : f32 to vector<8x8xf32>
    %543 = arith.maximumf %542, %541 : vector<8x8xf32>
    %544 = vector.broadcast %cst_250 : f32 to vector<8x8xf32>
    %545 = arith.minimumf %544, %543 : vector<8x8xf32>
    %cst_251 = arith.constant 1.000000e+00 : f32
    %546 = vector.broadcast %cst_251 : f32 to vector<8x8xf32>
    %547 = arith.addf %546, %545 : vector<8x8xf32>
    %cst_252 = arith.constant 1.000000e+00 : f32
    %548 = vector.broadcast %cst_252 : f32 to vector<8x8xf32>
    %549 = arith.subf %548, %545 : vector<8x8xf32>
    %550 = tpu.reciprocal %549 : vector<8x8xf32> -> vector<8x8xf32>
    %551 = arith.mulf %547, %550 : vector<8x8xf32>
    %552 = math.log %551 : vector<8x8xf32>
    %cst_253 = arith.constant 1.000000e+00 : f32
    %553 = vector.broadcast %cst_253 : f32 to vector<8x8xf32>
    %554 = arith.mulf %553, %552 : vector<8x8xf32>
    %cst_254 = arith.constant 0.000000e+00 : f32
    %555 = vector.broadcast %cst_254 : f32 to vector<8x8xf32>
    %556 = arith.subf %555, %554 : vector<8x8xf32>
    %557 = math.exp %556 : vector<8x8xf32>
    %cst_255 = arith.constant dense<0.000000e+00> : vector<8xf32>
    %558 = vector.multi_reduction <add>, %557, %cst_255 [1] : vector<8x8xf32> to vector<8xf32>
    %559 = vector.shape_cast %558 : vector<8xf32> to vector<8x1xf32>
    %560 = tpu.reciprocal %559 : vector<8x1xf32> -> vector<8x1xf32>
    %561 = vector.broadcast %560 : vector<8x1xf32> to vector<8x8xf32>
    %562 = arith.mulf %557, %561 : vector<8x8xf32>
    %c1_256 = arith.constant 1 : index
    %c2_257 = arith.constant 2 : index
    %c0_258 = arith.constant 0 : index
    %c0_259 = arith.constant 0 : index
    %563 = vector.load %arg8[%c1_256, %c2_257, %c0_258, %c0_259] : memref<2x4x8x8xf32, #tpu.memory_space<vmem>>, vector<1x1x8x8xf32>
    %564 = vector.shape_cast %563 : vector<1x1x8x8xf32> to vector<8x8xf32>
    %565 = vector.shape_cast %562 : vector<8x8xf32> to vector<1x1x8x8xf32>
    tpu.vector_store %arg8[%c1_256, %c2_257, %c0_258, %c0_259], %565 {strides = array<i32>} : memref<2x4x8x8xf32, #tpu.memory_space<vmem>>, vector<1x1x8x8xf32>,
    %cst_260 = arith.constant dense<0.000000e+00> : vector<8x8xf32>
    %566 = tpu.matmul %562, %488, %cst_260 {dimension_numbers = #tpu.dot_dimension_numbers<[1], [0], [0], [1], [0, 0, 1, 1], [], []>} : vector<8x8xf32>, vector<8x8xf32>, vector<8x8xf32> -> vector<8x8xf32>
    %cst_261 = arith.constant dense<0.000000e+00> : vector<8x32xf32>
    %567 = tpu.matmul %566, %402, %cst_261 {dimension_numbers = #tpu.dot_dimension_numbers<[1], [0], [0], [1], [0, 0, 1, 1], [], []>} : vector<8x8xf32>, vector<8x32xf32>, vector<8x32xf32> -> vector<8x32xf32>
    %568 = arith.addf %379, %567 : vector<8x32xf32>
    %c0_262 = arith.constant 0 : index
    %c3 = arith.constant 3 : index
    %c0_263 = arith.constant 0 : index
    %c0_264 = arith.constant 0 : index
    %569 = vector.load %arg3[%c0_262, %c3, %c0_263, %c0_264] : memref<3x4x32x8xf32, #tpu.memory_space<vmem>>, vector<1x1x32x8xf32>
    %570 = vector.shape_cast %569 : vector<1x1x32x8xf32> to vector<32x8xf32>
    %cst_265 = arith.constant dense<0.000000e+00> : vector<16x8xf32>
    %571 = tpu.matmul %0, %570, %cst_265 {dimension_numbers = #tpu.dot_dimension_numbers<[1], [0], [0], [1], [0, 0, 1, 1], [], []>} : vector<16x32xf32>, vector<32x8xf32>, vector<16x8xf32> -> vector<16x8xf32>
    %c0_266 = arith.constant 0 : index
    %c3_267 = arith.constant 3 : index
    %c0_268 = arith.constant 0 : index
    %c0_269 = arith.constant 0 : index
    %572 = vector.load %arg4[%c0_266, %c3_267, %c0_268, %c0_269] : memref<3x4x1x8xf32, #tpu.memory_space<vmem>>, vector<1x1x1x8xf32>
    %573 = vector.shape_cast %572 : vector<1x1x1x8xf32> to vector<1x8xf32>
    %574 = vector.broadcast %573 : vector<1x8xf32> to vector<16x8xf32>
    %575 = arith.addf %571, %574 : vector<16x8xf32>
    %c1_270 = arith.constant 1 : index
    %c3_271 = arith.constant 3 : index
    %c0_272 = arith.constant 0 : index
    %c0_273 = arith.constant 0 : index
    %576 = vector.load %arg3[%c1_270, %c3_271, %c0_272, %c0_273] : memref<3x4x32x8xf32, #tpu.memory_space<vmem>>, vector<1x1x32x8xf32>
    %577 = vector.shape_cast %576 : vector<1x1x32x8xf32> to vector<32x8xf32>
    %cst_274 = arith.constant dense<0.000000e+00> : vector<16x8xf32>
    %578 = tpu.matmul %1, %577, %cst_274 {dimension_numbers = #tpu.dot_dimension_numbers<[1], [0], [0], [1], [0, 0, 1, 1], [], []>} : vector<16x32xf32>, vector<32x8xf32>, vector<16x8xf32> -> vector<16x8xf32>
    %c1_275 = arith.constant 1 : index
    %c3_276 = arith.constant 3 : index
    %c0_277 = arith.constant 0 : index
    %c0_278 = arith.constant 0 : index
    %579 = vector.load %arg4[%c1_275, %c3_276, %c0_277, %c0_278] : memref<3x4x1x8xf32, #tpu.memory_space<vmem>>, vector<1x1x1x8xf32>
    %580 = vector.shape_cast %579 : vector<1x1x1x8xf32> to vector<1x8xf32>
    %581 = vector.broadcast %580 : vector<1x8xf32> to vector<16x8xf32>
    %582 = arith.addf %578, %581 : vector<16x8xf32>
    %c2_279 = arith.constant 2 : index
    %c3_280 = arith.constant 3 : index
    %c0_281 = arith.constant 0 : index
    %c0_282 = arith.constant 0 : index
    %583 = vector.load %arg3[%c2_279, %c3_280, %c0_281, %c0_282] : memref<3x4x32x8xf32, #tpu.memory_space<vmem>>, vector<1x1x32x8xf32>
    %584 = vector.shape_cast %583 : vector<1x1x32x8xf32> to vector<32x8xf32>
    %cst_283 = arith.constant dense<0.000000e+00> : vector<16x8xf32>
    %585 = tpu.matmul %2, %584, %cst_283 {dimension_numbers = #tpu.dot_dimension_numbers<[1], [0], [0], [1], [0, 0, 1, 1], [], []>} : vector<16x32xf32>, vector<32x8xf32>, vector<16x8xf32> -> vector<16x8xf32>
    %c2_284 = arith.constant 2 : index
    %c3_285 = arith.constant 3 : index
    %c0_286 = arith.constant 0 : index
    %c0_287 = arith.constant 0 : index
    %586 = vector.load %arg4[%c2_284, %c3_285, %c0_286, %c0_287] : memref<3x4x1x8xf32, #tpu.memory_space<vmem>>, vector<1x1x1x8xf32>
    %587 = vector.shape_cast %586 : vector<1x1x1x8xf32> to vector<1x8xf32>
    %588 = vector.broadcast %587 : vector<1x8xf32> to vector<16x8xf32>
    %589 = arith.addf %585, %588 : vector<16x8xf32>
    %c3_288 = arith.constant 3 : index
    %c0_289 = arith.constant 0 : index
    %c0_290 = arith.constant 0 : index
    %590 = vector.load %arg5[%c3_288, %c0_289, %c0_290] : memref<4x8x32xf32, #tpu.memory_space<vmem>>, vector<1x8x32xf32>
    %591 = vector.shape_cast %590 : vector<1x8x32xf32> to vector<8x32xf32>
    %592 = vector.extract_strided_slice %575 {offsets = [0, 0], sizes = [8, 8], strides = [1, 1]} : vector<16x8xf32> to vector<8x8xf32>
    %593 = vector.extract_strided_slice %582 {offsets = [0, 0], sizes = [8, 8], strides = [1, 1]} : vector<16x8xf32> to vector<8x8xf32>
    %594 = vector.extract_strided_slice %589 {offsets = [0, 0], sizes = [8, 8], strides = [1, 1]} : vector<16x8xf32> to vector<8x8xf32>
    %595 = tpu.transpose %593, [1, 0] : vector<8x8xf32> -> vector<8x8xf32>
    %cst_291 = arith.constant dense<0.000000e+00> : vector<8x8xf32>
    %596 = tpu.matmul %592, %595, %cst_291 {dimension_numbers = #tpu.dot_dimension_numbers<[1], [0], [0], [1], [0, 0, 1, 1], [], []>} : vector<8x8xf32>, vector<8x8xf32>, vector<8x8xf32> -> vector<8x8xf32>
    %597 = arith.mulf %592, %592 : vector<8x8xf32>
    %cst_292 = arith.constant dense<0.000000e+00> : vector<8xf32>
    %598 = vector.multi_reduction <add>, %597, %cst_292 [1] : vector<8x8xf32> to vector<8xf32>
    %599 = vector.shape_cast %598 : vector<8xf32> to vector<8x1xf32>
    %600 = arith.mulf %593, %593 : vector<8x8xf32>
    %cst_293 = arith.constant dense<0.000000e+00> : vector<8xf32>
    %601 = vector.multi_reduction <add>, %600, %cst_293 [1] : vector<8x8xf32> to vector<8xf32>
    %602 = vector.shape_cast %601 : vector<8xf32> to vector<8x1xf32>
    %603 = tpu.transpose %602, [1, 0] : vector<8x1xf32> -> vector<1x8xf32>
    %cst_294 = arith.constant 2.000000e+00 : f32
    %604 = vector.broadcast %cst_294 : f32 to vector<8x8xf32>
    %605 = arith.mulf %604, %596 : vector<8x8xf32>
    %cst_295 = arith.constant 1.000000e+00 : f32
    %606 = vector.broadcast %cst_295 : f32 to vector<8x8xf32>
    %607 = arith.subf %606, %605 : vector<8x8xf32>
    %cst_296 = arith.constant 1.000000e+00 : f32
    %608 = vector.broadcast %cst_296 : f32 to vector<1x8xf32>
    %609 = arith.mulf %608, %603 : vector<1x8xf32>
    %610 = vector.broadcast %609 : vector<1x8xf32> to vector<8x8xf32>
    %611 = arith.addf %607, %610 : vector<8x8xf32>
    %cst_297 = arith.constant 1.000000e+00 : f32
    %612 = vector.broadcast %cst_297 : f32 to vector<8x1xf32>
    %613 = arith.mulf %612, %599 : vector<8x1xf32>
    %cst_298 = arith.constant 1.000000e+00 : f32
    %614 = vector.broadcast %cst_298 : f32 to vector<8x1xf32>
    %615 = arith.subf %614, %613 : vector<8x1xf32>
    %cst_299 = arith.constant 2.000000e+00 : f32
    %616 = vector.broadcast %cst_299 : f32 to vector<8x8xf32>
    %617 = arith.mulf %616, %596 : vector<8x8xf32>
    %cst_300 = arith.constant 1.000000e+00 : f32
    %618 = vector.broadcast %cst_300 : f32 to vector<8x8xf32>
    %619 = arith.subf %618, %617 : vector<8x8xf32>
    %cst_301 = arith.constant 1.000000e+00 : f32
    %620 = vector.broadcast %cst_301 : f32 to vector<8x1xf32>
    %621 = arith.mulf %620, %599 : vector<8x1xf32>
    %622 = vector.broadcast %621 : vector<8x1xf32> to vector<8x8xf32>
    %623 = vector.broadcast %603 : vector<1x8xf32> to vector<8x8xf32>
    %624 = arith.mulf %622, %623 : vector<8x8xf32>
    %625 = arith.addf %619, %624 : vector<8x8xf32>
    %cst_302 = arith.constant 1.000000e-15 : f32
    %626 = vector.broadcast %cst_302 : f32 to vector<8x8xf32>
    %627 = arith.maximumf %625, %626 : vector<8x8xf32>
    %628 = arith.mulf %611, %611 : vector<8x8xf32>
    %629 = vector.broadcast %599 : vector<8x1xf32> to vector<8x8xf32>
    %630 = arith.mulf %628, %629 : vector<8x8xf32>
    %cst_303 = arith.constant 2.000000e+00 : f32
    %631 = vector.broadcast %cst_303 : f32 to vector<8x8xf32>
    %632 = arith.mulf %631, %611 : vector<8x8xf32>
    %633 = vector.broadcast %615 : vector<8x1xf32> to vector<8x8xf32>
    %634 = arith.mulf %632, %633 : vector<8x8xf32>
    %635 = arith.mulf %634, %596 : vector<8x8xf32>
    %636 = arith.subf %630, %635 : vector<8x8xf32>
    %637 = arith.mulf %615, %615 : vector<8x1xf32>
    %638 = vector.broadcast %637 : vector<8x1xf32> to vector<8x8xf32>
    %639 = vector.broadcast %603 : vector<1x8xf32> to vector<8x8xf32>
    %640 = arith.mulf %638, %639 : vector<8x8xf32>
    %641 = arith.addf %636, %640 : vector<8x8xf32>
    %cst_304 = arith.constant 0.000000e+00 : f32
    %642 = vector.broadcast %cst_304 : f32 to vector<8x8xf32>
    %643 = arith.maximumf %641, %642 : vector<8x8xf32>
    %644 = math.sqrt %643 : vector<8x8xf32>
    %645 = arith.divf %644, %627 : vector<8x8xf32>
    %cst_305 = arith.constant 1.000000e+00 : f32
    %646 = vector.broadcast %cst_305 : f32 to vector<8x8xf32>
    %647 = arith.mulf %646, %645 : vector<8x8xf32>
    %cst_306 = arith.constant -0.99999988 : f32
    %cst_307 = arith.constant 0.99999988 : f32
    %648 = vector.broadcast %cst_306 : f32 to vector<8x8xf32>
    %649 = arith.maximumf %648, %647 : vector<8x8xf32>
    %650 = vector.broadcast %cst_307 : f32 to vector<8x8xf32>
    %651 = arith.minimumf %650, %649 : vector<8x8xf32>
    %cst_308 = arith.constant 1.000000e+00 : f32
    %652 = vector.broadcast %cst_308 : f32 to vector<8x8xf32>
    %653 = arith.addf %652, %651 : vector<8x8xf32>
    %cst_309 = arith.constant 1.000000e+00 : f32
    %654 = vector.broadcast %cst_309 : f32 to vector<8x8xf32>
    %655 = arith.subf %654, %651 : vector<8x8xf32>
    %656 = tpu.reciprocal %655 : vector<8x8xf32> -> vector<8x8xf32>
    %657 = arith.mulf %653, %656 : vector<8x8xf32>
    %658 = math.log %657 : vector<8x8xf32>
    %cst_310 = arith.constant 1.000000e+00 : f32
    %659 = vector.broadcast %cst_310 : f32 to vector<8x8xf32>
    %660 = arith.mulf %659, %658 : vector<8x8xf32>
    %cst_311 = arith.constant 0.000000e+00 : f32
    %661 = vector.broadcast %cst_311 : f32 to vector<8x8xf32>
    %662 = arith.subf %661, %660 : vector<8x8xf32>
    %663 = math.exp %662 : vector<8x8xf32>
    %cst_312 = arith.constant dense<0.000000e+00> : vector<8xf32>
    %664 = vector.multi_reduction <add>, %663, %cst_312 [1] : vector<8x8xf32> to vector<8xf32>
    %665 = vector.shape_cast %664 : vector<8xf32> to vector<8x1xf32>
    %666 = tpu.reciprocal %665 : vector<8x1xf32> -> vector<8x1xf32>
    %667 = vector.broadcast %666 : vector<8x1xf32> to vector<8x8xf32>
    %668 = arith.mulf %663, %667 : vector<8x8xf32>
    %c0_313 = arith.constant 0 : index
    %c3_314 = arith.constant 3 : index
    %c0_315 = arith.constant 0 : index
    %c0_316 = arith.constant 0 : index
    %669 = vector.load %arg8[%c0_313, %c3_314, %c0_315, %c0_316] : memref<2x4x8x8xf32, #tpu.memory_space<vmem>>, vector<1x1x8x8xf32>
    %670 = vector.shape_cast %669 : vector<1x1x8x8xf32> to vector<8x8xf32>
    %671 = vector.shape_cast %668 : vector<8x8xf32> to vector<1x1x8x8xf32>
    tpu.vector_store %arg8[%c0_313, %c3_314, %c0_315, %c0_316], %671 {strides = array<i32>} : memref<2x4x8x8xf32, #tpu.memory_space<vmem>>, vector<1x1x8x8xf32>,
    %cst_317 = arith.constant dense<0.000000e+00> : vector<8x8xf32>
    %672 = tpu.matmul %668, %594, %cst_317 {dimension_numbers = #tpu.dot_dimension_numbers<[1], [0], [0], [1], [0, 0, 1, 1], [], []>} : vector<8x8xf32>, vector<8x8xf32>, vector<8x8xf32> -> vector<8x8xf32>
    %cst_318 = arith.constant dense<0.000000e+00> : vector<8x32xf32>
    %673 = tpu.matmul %672, %591, %cst_318 {dimension_numbers = #tpu.dot_dimension_numbers<[1], [0], [0], [1], [0, 0, 1, 1], [], []>} : vector<8x8xf32>, vector<8x32xf32>, vector<8x32xf32> -> vector<8x32xf32>
    %674 = arith.addf %485, %673 : vector<8x32xf32>
    %675 = vector.extract_strided_slice %575 {offsets = [8, 0], sizes = [8, 8], strides = [1, 1]} : vector<16x8xf32> to vector<8x8xf32>
    %676 = vector.extract_strided_slice %582 {offsets = [8, 0], sizes = [8, 8], strides = [1, 1]} : vector<16x8xf32> to vector<8x8xf32>
    %677 = vector.extract_strided_slice %589 {offsets = [8, 0], sizes = [8, 8], strides = [1, 1]} : vector<16x8xf32> to vector<8x8xf32>
    %678 = tpu.transpose %676, [1, 0] : vector<8x8xf32> -> vector<8x8xf32>
    %cst_319 = arith.constant dense<0.000000e+00> : vector<8x8xf32>
    %679 = tpu.matmul %675, %678, %cst_319 {dimension_numbers = #tpu.dot_dimension_numbers<[1], [0], [0], [1], [0, 0, 1, 1], [], []>} : vector<8x8xf32>, vector<8x8xf32>, vector<8x8xf32> -> vector<8x8xf32>
    %680 = arith.mulf %675, %675 : vector<8x8xf32>
    %cst_320 = arith.constant dense<0.000000e+00> : vector<8xf32>
    %681 = vector.multi_reduction <add>, %680, %cst_320 [1] : vector<8x8xf32> to vector<8xf32>
    %682 = vector.shape_cast %681 : vector<8xf32> to vector<8x1xf32>
    %683 = arith.mulf %676, %676 : vector<8x8xf32>
    %cst_321 = arith.constant dense<0.000000e+00> : vector<8xf32>
    %684 = vector.multi_reduction <add>, %683, %cst_321 [1] : vector<8x8xf32> to vector<8xf32>
    %685 = vector.shape_cast %684 : vector<8xf32> to vector<8x1xf32>
    %686 = tpu.transpose %685, [1, 0] : vector<8x1xf32> -> vector<1x8xf32>
    %cst_322 = arith.constant 2.000000e+00 : f32
    %687 = vector.broadcast %cst_322 : f32 to vector<8x8xf32>
    %688 = arith.mulf %687, %679 : vector<8x8xf32>
    %cst_323 = arith.constant 1.000000e+00 : f32
    %689 = vector.broadcast %cst_323 : f32 to vector<8x8xf32>
    %690 = arith.subf %689, %688 : vector<8x8xf32>
    %cst_324 = arith.constant 1.000000e+00 : f32
    %691 = vector.broadcast %cst_324 : f32 to vector<1x8xf32>
    %692 = arith.mulf %691, %686 : vector<1x8xf32>
    %693 = vector.broadcast %692 : vector<1x8xf32> to vector<8x8xf32>
    %694 = arith.addf %690, %693 : vector<8x8xf32>
    %cst_325 = arith.constant 1.000000e+00 : f32
    %695 = vector.broadcast %cst_325 : f32 to vector<8x1xf32>
    %696 = arith.mulf %695, %682 : vector<8x1xf32>
    %cst_326 = arith.constant 1.000000e+00 : f32
    %697 = vector.broadcast %cst_326 : f32 to vector<8x1xf32>
    %698 = arith.subf %697, %696 : vector<8x1xf32>
    %cst_327 = arith.constant 2.000000e+00 : f32
    %699 = vector.broadcast %cst_327 : f32 to vector<8x8xf32>
    %700 = arith.mulf %699, %679 : vector<8x8xf32>
    %cst_328 = arith.constant 1.000000e+00 : f32
    %701 = vector.broadcast %cst_328 : f32 to vector<8x8xf32>
    %702 = arith.subf %701, %700 : vector<8x8xf32>
    %cst_329 = arith.constant 1.000000e+00 : f32
    %703 = vector.broadcast %cst_329 : f32 to vector<8x1xf32>
    %704 = arith.mulf %703, %682 : vector<8x1xf32>
    %705 = vector.broadcast %704 : vector<8x1xf32> to vector<8x8xf32>
    %706 = vector.broadcast %686 : vector<1x8xf32> to vector<8x8xf32>
    %707 = arith.mulf %705, %706 : vector<8x8xf32>
    %708 = arith.addf %702, %707 : vector<8x8xf32>
    %cst_330 = arith.constant 1.000000e-15 : f32
    %709 = vector.broadcast %cst_330 : f32 to vector<8x8xf32>
    %710 = arith.maximumf %708, %709 : vector<8x8xf32>
    %711 = arith.mulf %694, %694 : vector<8x8xf32>
    %712 = vector.broadcast %682 : vector<8x1xf32> to vector<8x8xf32>
    %713 = arith.mulf %711, %712 : vector<8x8xf32>
    %cst_331 = arith.constant 2.000000e+00 : f32
    %714 = vector.broadcast %cst_331 : f32 to vector<8x8xf32>
    %715 = arith.mulf %714, %694 : vector<8x8xf32>
    %716 = vector.broadcast %698 : vector<8x1xf32> to vector<8x8xf32>
    %717 = arith.mulf %715, %716 : vector<8x8xf32>
    %718 = arith.mulf %717, %679 : vector<8x8xf32>
    %719 = arith.subf %713, %718 : vector<8x8xf32>
    %720 = arith.mulf %698, %698 : vector<8x1xf32>
    %721 = vector.broadcast %720 : vector<8x1xf32> to vector<8x8xf32>
    %722 = vector.broadcast %686 : vector<1x8xf32> to vector<8x8xf32>
    %723 = arith.mulf %721, %722 : vector<8x8xf32>
    %724 = arith.addf %719, %723 : vector<8x8xf32>
    %cst_332 = arith.constant 0.000000e+00 : f32
    %725 = vector.broadcast %cst_332 : f32 to vector<8x8xf32>
    %726 = arith.maximumf %724, %725 : vector<8x8xf32>
    %727 = math.sqrt %726 : vector<8x8xf32>
    %728 = arith.divf %727, %710 : vector<8x8xf32>
    %cst_333 = arith.constant 1.000000e+00 : f32
    %729 = vector.broadcast %cst_333 : f32 to vector<8x8xf32>
    %730 = arith.mulf %729, %728 : vector<8x8xf32>
    %cst_334 = arith.constant -0.99999988 : f32
    %cst_335 = arith.constant 0.99999988 : f32
    %731 = vector.broadcast %cst_334 : f32 to vector<8x8xf32>
    %732 = arith.maximumf %731, %730 : vector<8x8xf32>
    %733 = vector.broadcast %cst_335 : f32 to vector<8x8xf32>
    %734 = arith.minimumf %733, %732 : vector<8x8xf32>
    %cst_336 = arith.constant 1.000000e+00 : f32
    %735 = vector.broadcast %cst_336 : f32 to vector<8x8xf32>
    %736 = arith.addf %735, %734 : vector<8x8xf32>
    %cst_337 = arith.constant 1.000000e+00 : f32
    %737 = vector.broadcast %cst_337 : f32 to vector<8x8xf32>
    %738 = arith.subf %737, %734 : vector<8x8xf32>
    %739 = tpu.reciprocal %738 : vector<8x8xf32> -> vector<8x8xf32>
    %740 = arith.mulf %736, %739 : vector<8x8xf32>
    %741 = math.log %740 : vector<8x8xf32>
    %cst_338 = arith.constant 1.000000e+00 : f32
    %742 = vector.broadcast %cst_338 : f32 to vector<8x8xf32>
    %743 = arith.mulf %742, %741 : vector<8x8xf32>
    %cst_339 = arith.constant 0.000000e+00 : f32
    %744 = vector.broadcast %cst_339 : f32 to vector<8x8xf32>
    %745 = arith.subf %744, %743 : vector<8x8xf32>
    %746 = math.exp %745 : vector<8x8xf32>
    %cst_340 = arith.constant dense<0.000000e+00> : vector<8xf32>
    %747 = vector.multi_reduction <add>, %746, %cst_340 [1] : vector<8x8xf32> to vector<8xf32>
    %748 = vector.shape_cast %747 : vector<8xf32> to vector<8x1xf32>
    %749 = tpu.reciprocal %748 : vector<8x1xf32> -> vector<8x1xf32>
    %750 = vector.broadcast %749 : vector<8x1xf32> to vector<8x8xf32>
    %751 = arith.mulf %746, %750 : vector<8x8xf32>
    %c1_341 = arith.constant 1 : index
    %c3_342 = arith.constant 3 : index
    %c0_343 = arith.constant 0 : index
    %c0_344 = arith.constant 0 : index
    %752 = vector.load %arg8[%c1_341, %c3_342, %c0_343, %c0_344] : memref<2x4x8x8xf32, #tpu.memory_space<vmem>>, vector<1x1x8x8xf32>
    %753 = vector.shape_cast %752 : vector<1x1x8x8xf32> to vector<8x8xf32>
    %754 = vector.shape_cast %751 : vector<8x8xf32> to vector<1x1x8x8xf32>
    tpu.vector_store %arg8[%c1_341, %c3_342, %c0_343, %c0_344], %754 {strides = array<i32>} : memref<2x4x8x8xf32, #tpu.memory_space<vmem>>, vector<1x1x8x8xf32>,
    %cst_345 = arith.constant dense<0.000000e+00> : vector<8x8xf32>
    %755 = tpu.matmul %751, %677, %cst_345 {dimension_numbers = #tpu.dot_dimension_numbers<[1], [0], [0], [1], [0, 0, 1, 1], [], []>} : vector<8x8xf32>, vector<8x8xf32>, vector<8x8xf32> -> vector<8x8xf32>
    %cst_346 = arith.constant dense<0.000000e+00> : vector<8x32xf32>
    %756 = tpu.matmul %755, %591, %cst_346 {dimension_numbers = #tpu.dot_dimension_numbers<[1], [0], [0], [1], [0, 0, 1, 1], [], []>} : vector<8x8xf32>, vector<8x32xf32>, vector<8x32xf32> -> vector<8x32xf32>
    %757 = arith.addf %568, %756 : vector<8x32xf32>
    %758 = vector.broadcast %3 : vector<1x32xf32> to vector<8x32xf32>
    %759 = arith.addf %674, %758 : vector<8x32xf32>
    %c0_347 = arith.constant 0 : index
    %c0_348 = arith.constant 0 : index
    %760 = vector.load %arg7[%c0_347, %c0_348] : memref<16x32xf32, #tpu.memory_space<vmem>>, vector<8x32xf32>
    tpu.vector_store %arg7[%c0_347, %c0_348], %759 {strides = array<i32>} : memref<16x32xf32, #tpu.memory_space<vmem>>, vector<8x32xf32>,
    %761 = vector.broadcast %3 : vector<1x32xf32> to vector<8x32xf32>
    %762 = arith.addf %757, %761 : vector<8x32xf32>
    %c8 = arith.constant 8 : index
    %c0_349 = arith.constant 0 : index
    %763 = vector.load %arg7[%c8, %c0_349] : memref<16x32xf32, #tpu.memory_space<vmem>>, vector<8x32xf32>
    tpu.vector_store %arg7[%c8, %c0_349], %762 {strides = array<i32>} : memref<16x32xf32, #tpu.memory_space<vmem>>, vector<8x32xf32>,
    return
  }
}

</mosaic_0001>

<bundles_post_ra>
// kernel: mhha_forward.1
= control target key start
LH: loop header
LB: loop body
LE: loop exit
PB: predicated region body
PF: predicated region fallthrough
CT: control target
= control target key end

     0   :  { %14 = vsyncpa [#allocation3], 0  ;;  %vm48_vm0 = vcmask 261120   ;;  %s4965_s0 = inlined_call_operand.vmem [shape: f32[16,32], index: 0, kind: input, shape index: {}]   ;;  %s4966_s1 = inlined_call_operand.vmem [shape: f32[16,32], index: 1, kind: input, shape index: {}]   ;;  %s4967_s2 = inlined_call_operand.vmem [shape: f32[16,32], index: 2, kind: input, shape index: {}]   ;;  %s4968_s3 = inlined_call_operand.vmem [shape: f32[3,4,32,8], index: 3, kind: input, shape index: {}]   ;;  %s4969_s4 = inlined_call_operand.vmem [shape: f32[3,4,1,8], index: 4, kind: input, shape index: {}]   ;;  %s4970_s5 = inlined_call_operand.vmem [shape: f32[4,8,32], index: 5, kind: input, shape index: {}]   ;;  %s4971_s6 = inlined_call_operand.vmem [shape: f32[1,32], index: 6, kind: input, shape index: {}]   ;;  %s4972_s7 = inlined_call_operand.hbm [shape: f32[16,32], index: 7, kind: output, shape index: {0}]   ;;  %s4973_s8 = inlined_call_operand.hbm [shape: f32[2,4,8,8], index: 8, kind: output, shape index: {1}]  }
   0x1   :  { %v3646_v0 = vld [vmem:[%s4968_s3 + $0x80] sm:$0xff]  ;;  %v3647_v1 = vld [vmem:[%s4968_s3 + $0x88] sm:$0xff]  ;;  %v3648_v2 = vld [vmem:[%s4968_s3 + $0x90] sm:$0xff] }
   0x2   :  { %v4158_v3 = vpack.c.bf16 %v3647_v1, %v3646_v0  ;;  %v3649_v4 = vld [vmem:[%s4968_s3 + $0x98] sm:$0xff]  ;;  %v4468_v5 = vld [vmem:[%s4966_s1] sm:$0xff]  ;;  %v38_v8 = vld [vmem:[%s4968_s3 + $0x8] sm:$0xff] }
   0x3   :  { %v4162_v6 = vpack.c.bf16 %v3649_v4, %v3648_v2  ;;  %3917 = vmatprep.mubr.msk.f32.mxu1 %vm48_vm0, %v4468_v5  ;;  %v37_v7 = vld [vmem:[%s4968_s3] sm:$0xff]  ;;  %v39_v9 = vld [vmem:[%s4968_s3 + $0x10] sm:$0xff]  ;;  %v40_v11 = vld [vmem:[%s4968_s3 + $0x18] sm:$0xff] }
   0x4   :  { %4159 = vmatprep.subr.bf16.mxu1 %v4158_v3  ;;  %v4150_v10 = vpack.c.bf16 %v38_v8, %v37_v7  ;;  %v4487_v12 = vld [vmem:[%s4965_s0] sm:$0xff]  ;;  %v4154_v13 = vpack.c.bf16 %v40_v11, %v39_v9  ;;  %v3655_v15 = vld [vmem:[%s4968_s3 + $0x108] sm:$0xff] }
   0x5   :  { %4161 = vmatpush3.bf16.msra.mxu1 %v4158_v3  ;;  %3906 = vmatprep.mubr.msk.f32.mxu0 %vm48_vm0, %v4487_v12  ;;  %v3654_v14 = vld [vmem:[%s4968_s3 + $0x100] sm:$0xff] }
   0x6   :  { %4163 = vmatprep.subr.bf16.mxu1 %v4162_v6  ;;  %4151 = vmatprep.subr.bf16.mxu0 %v4150_v10 }
   0x7   :  { %15 = vsyncpa [#allocation5], 0  ;;  %4153 = vmatpush3.bf16.msra.mxu0 %v4150_v10  ;;  %v4166_v16 = vpack.c.bf16 %v3655_v15, %v3654_v14  ;;  %v4500_v17 = vld [vmem:[%s4966_s1 + $0x8] sm:$0xff]  ;;  %v3656_v18 = vld [vmem:[%s4968_s3 + $0x110] sm:$0xff]  ;;  %v4402_v23 = vmov 0.0   ;;  %vm4403_vm1 = vmmov 0   ;;  %v438_v54 = vlaneseq }
   0x8   :  { %4155 = vmatprep.subr.bf16.mxu0 %v4154_v13  ;;  %v3657_v19 = vld [vmem:[%s4968_s3 + $0x118] sm:$0xff]  ;;  %v4511_v20 = vld [vmem:[%s4965_s0 + $0x8] sm:$0xff]  ;;  %v4520_v22 = vld [vmem:[%s4967_s2] sm:$0xff]  ;;  %vm319_vm2 = vcmask 64512  }
   0x9   :  { %4165 = vmatpush3.bf16.msra.mxu1 %v4162_v6  ;;  %v4170_v21 = vpack.c.bf16 %v3657_v19, %v3656_v18  ;;  %v4528_v24 = vld [vmem:[%s4967_s2 + $0x8] sm:$0xff]  ;;  %v3651_v25 = vld [vmem:[%s4969_s4 + $0x4] ss:$0 sm:$0xff]  ;;  %v3643_v27 = vld [vmem:[%s4969_s4] ss:$0 sm:$0xff]  ;;  %v439_v55 = vshrl.u32 %v438_v54, 7 }
   0xa   :  { %3931 = vmatprep.subr.mxu1 %v4402_v23  ;;  %v3659_v43 = vld [vmem:[%s4969_s4 + $0x8] ss:$0 sm:$0xff] }
   0xb   :  { %4157 = vmatpush3.bf16.msra.mxu0 %v4154_v13  ;;  %v4562_v58 = vsub.s32 0, %v439_v55 }
   0xc   :  { %3918 = vmatmul.mubr.msk.f32.vlgmr.msra.gmra.mrb[0].mxu1 %vm48_vm0, %v4500_v17  ;;  %4167 = vmatprep.subr.bf16.mxu0 %v4166_v16 }
   0xd   :  { %3933 = vmatprep.mubr.msk.f32.mxu1 %vm4403_vm1, %v4402_v23 }
   0xe   :  { %3907 = vmatmul.mubr.msk.f32.vlgmr.msra.gmra.mrb[0].mxu0 %vm48_vm0, %v4511_v20 }
   0xf   :  { %4169 = vmatpush3.bf16.msra.mxu0 %v4166_v16  ;;  %3928 = vmatprep.mubr.msk.f32.mxu0 %vm48_vm0, %v4520_v22 }
  0x10   :  { %4171 = vmatprep.subr.bf16.mxu0 %v4170_v21 }
  0x13   :  { %4173 = vmatpush3.bf16.msra.mxu0 %v4170_v21 }
  0x14   :  { %3941 = vmatprep.subr.mxu0 %v4402_v23 }
  0x16   :  { %3929 = vmatmul.mubr.msk.f32.vlgmr.msra.gmra.mrb[2].mxu0 %vm48_vm0, %v4528_v24 }
  0x17   :  { %3943 = vmatprep.mubr.msk.f32.mxu0 %vm4403_vm1, %v4402_v23 }
  0xdf   :  { %v3919_v26 = vpop.f32.mrb[0].mxu1 }
  0xe0   :  { %v221_v28 = vadd.f32 %v3919_v26, %v3651_v25  ;;  %v215_v29 = vpop.f32.mrb[1].mxu1 }
  0xe1   :  { %v216_v30 = vadd.f32 %v3651_v25, %v215_v29  ;;  %v3908_v31 = vpop.f32.mrb[0].mxu0 }
  0xe2   :  { %3942 = vmatpush3.xpose.msk.msra.mxu0 %vm319_vm2, %v221_v28  ;;  %v127_v32 = vadd.f32 %v3908_v31, %v3643_v27  ;;  %v121_v33 = vpop.f32.mrb[1].mxu0  ;;  %v636_v38 = vmul.f32 %v221_v28, %v221_v28 }
  0xe3   :  { %3932 = vmatpush3.xpose.msk.msra.mxu1 %vm319_vm2, %v216_v30  ;;  %v400_v34 = vmul.f32 %v216_v30, %v216_v30  ;;  %v122_v35 = vadd.f32 %v3643_v27, %v121_v33 }
  0xe4   :  { %v632_v36 = vmul.f32 %v127_v32, %v127_v32  ;;  %3936 = vmatprep.subr.mxu1 %v4402_v23  ;;  %v637_v42 = vsel %vm319_vm2, %v636_v38, 0.0 }
  0xe5   :  { %v401_v37 = vsel %vm319_vm2, %v400_v34, 0.0  ;;  %3944 = vmatmul.mubr.msk.f32.vlgmr.msra.gmra.mrb[4].mxu0 %vm319_vm2, %v127_v32  ;;  %v396_v39 = vmul.f32 %v122_v35, %v122_v35 }
  0xe6   :  { %402 = vadd.xlane.f32.xlu0 %v401_v37  ;;  %v633_v40 = vsel %vm319_vm2, %v632_v36, 0.0  ;;  %3934 = vmatmul.mubr.msk.f32.vlgmr.msra.gmra.mrb[2].mxu1 %vm319_vm2, %v122_v35 }
  0xe7   :  { %634 = vadd.xlane.f32.xlu1 %v633_v40  ;;  %3938 = vmatprep.mubr.msk.f32.mxu1 %vm4403_vm1, %v4402_v23  ;;  %v397_v41 = vsel %vm319_vm2, %v396_v39, 0.0 }
  0xe8   :  { %3959 = vmatprep.mubr.msk.f32.mxu0 %vm48_vm0, %v4487_v12 }
  0xe9   :  { %v3930_v44 = vpop.f32.mrb[2].mxu0 }
  0xea   :  { %638 = vadd.xlane.f32.xlu0 %v637_v42  ;;  %v4559_v45 = vadd.f32 %v3930_v44, %v3659_v43  ;;  %v309_v46 = vpop.f32.mrb[3].mxu0 }
  0xeb   :  { %398 = vadd.xlane.f32.xlu1 %v397_v41  ;;  %v310_v47 = vadd.f32 %v3659_v43, %v309_v46 }
  0xed   :  { %3937 = vmatpush3.msra.mxu1 %v310_v47 }
  0xee   :  { %3946 = vmatprep.subr.mxu1 %v4402_v23 }
 0x173   :  { %v403_v48 = vpop.xlane.xlu0 %402 }
 0x174   :  { %404 = vxpose.xlu0.b32.start.end [1/1] (short) (narrow) %v403_v48, 8  ;;  %v635_v56 = vpop.xlane.xlu1 %634 }
 0x175   :  { %v679_v10 = vsub.f32 1.0, %v635_v56 }
 0x177   :  { %v639_v49 = vpop.xlane.xlu0 %638  ;;  %v689_v30 = vmul.f32 %v679_v10, %v679_v10 }
 0x178   :  { %640 = vxpose.xlu1.b32.start.end [1/1] (short) (narrow) %v639_v49, 8  ;;  %v399_v60 = vpop.xlane.xlu1 %398 }
 0x179   :  { %v443_v1 = vsub.f32 1.0, %v399_v60 }
 0x17b   :  { %v453_v11 = vmul.f32 %v443_v1, %v443_v1 }
 0x1b8   :  { %v628_v50 = vpop.f32.mrb[4].mxu0 }
 0x1b9   :  { %v392_v51 = vpop.f32.mrb[2].mxu1  ;;  %v3945_v52 = vpop.f32.mrb[5].mxu0  ;;  %v672_v62 = vmul.f32 2.0, %v628_v50 }
 0x1ba   :  { %v3935_v53 = vpop.f32.mrb[3].mxu1  ;;  %v436_v57 = vmul.f32 2.0, %v392_v51 }
 0x1bb   :  { %v673_v3 = vsub.f32 1.0, %v672_v62 }
 0x1bc   :  { %v437_v59 = vsub.f32 1.0, %v436_v57 }
 0x1f4   :  { %v420_v61 = vpop.trf.xlu0 }
 0x1f5   :  { %v441_v63 = vrot.slane %v420_v61, %v4562_v58 }
 0x1f7   :  { %v442_v0 = vadd.f32 %v441_v63, %v437_v59  ;;  %v444_v13 = vmul.f32 %v441_v63, %v399_v60  ;;  %v454_v21 = vmul.f32 %v453_v11, %v441_v63 }
 0x1f8   :  { %v656_v2 = vpop.trf.xlu1 }
 0x1f9   :  { %v447_v4 = vmul.f32 %v442_v0, %v442_v0  ;;  %v449_v6 = vmul.f32 2.0, %v442_v0  ;;  %v677_v7 = vrot.slane %v656_v2, %v4562_v58  ;;  %v445_v26 = vadd.f32 %v444_v13, %v437_v59 }
 0x1fb   :  { %v450_v8 = vmul.f32 %v449_v6, %v443_v1  ;;  %v678_v9 = vadd.f32 %v677_v7, %v673_v3  ;;  %v448_v14 = vmul.f32 %v447_v4, %v399_v60  ;;  %v680_v31 = vmul.f32 %v677_v7, %v635_v56 }
 0x1fc   :  { %v690_v34 = vmul.f32 %v689_v30, %v677_v7  ;;  %v446_v35 = vmax.f32 %v445_v26, 1e-15  ;;  %v3679_v30 = vld [vmem:[%s4968_s3 + $0xa8] sm:$0xff] }
 0x1fd   :  { %v451_v15 = vmul.f32 %v450_v8, %v392_v51  ;;  %v683_v16 = vmul.f32 %v678_v9, %v678_v9  ;;  %v685_v18 = vmul.f32 2.0, %v678_v9  ;;  %v681_v36 = vadd.f32 %v680_v31, %v673_v3 }
 0x1ff   :  { %v452_v19 = vsub.f32 %v448_v14, %v451_v15  ;;  %v686_v25 = vmul.f32 %v685_v18, %v679_v10  ;;  %v684_v28 = vmul.f32 %v683_v16, %v635_v56  ;;  %v682_v39 = vmax.f32 %v681_v36, 1e-15  ;;  %v3670_v16 = vld [vmem:[%s4968_s3 + $0x20] sm:$0xff]  ;;  %v3671_v18 = vld [vmem:[%s4968_s3 + $0x28] sm:$0xff] }
 0x201   :  { %v455_v27 = vadd.f32 %v454_v21, %v452_v19  ;;  %v687_v29 = vmul.f32 %v686_v25, %v628_v50  ;;  %v3672_v19 = vld [vmem:[%s4968_s3 + $0x30] sm:$0xff]  ;;  %v4174_v21 = vpack.c.bf16 %v3671_v18, %v3670_v16  ;;  %v3673_v25 = vld [vmem:[%s4968_s3 + $0x38] sm:$0xff] }
 0x202   :  { %v4178_v26 = vpack.c.bf16 %v3673_v25, %v3672_v19 }
 0x203   :  { %v456_v32 = vmax.f32 %v455_v27, 0.0  ;;  %v688_v33 = vsub.f32 %v684_v28, %v687_v29  ;;  %4175 = vmatprep.subr.bf16.mxu0 %v4174_v21  ;;  %v3678_v29 = vld [vmem:[%s4968_s3 + $0xa0] sm:$0xff] }
 0x204   :  { %4177 = vmatpush3.bf16.msra.mxu0 %v4174_v21 }
 0x205   :  { %4252 = vrsqrt.f32 %v456_v32  ;;  %v691_v37 = vadd.f32 %v690_v34, %v688_v33  ;;  %vm459_vm3 = vcmp.eq.f32.partialorder %v456_v32, inf  ;;  %v462_v42 = vand.u32 2147483648, %v456_v32  ;;  %4179 = vmatprep.subr.bf16.mxu0 %v4178_v26  ;;  %v3680_v34 = vld [vmem:[%s4968_s3 + $0xb0] sm:$0xff] }
 0x206   :  { %4254 = vrcp.f32 %v446_v35  ;;  %vm461_vm4 = vcmp.eq.f32.partialorder %v456_v32, 0.0  ;;  %v4182_v33 = vpack.c.bf16 %v3679_v30, %v3678_v29  ;;  %v3681_v35 = vld [vmem:[%s4968_s3 + $0xb8] sm:$0xff] }
 0x207   :  { %v692_v38 = vmax.f32 %v691_v37, 0.0 }
 0x208   :  { %4181 = vmatpush3.bf16.msra.mxu0 %v4178_v26 }
 0x209   :  { %4256 = vrsqrt.f32 %v692_v38  ;;  %vm695_vm5 = vcmp.eq.f32.partialorder %v692_v38, inf  ;;  %v698_v51 = vand.u32 2147483648, %v692_v38  ;;  %vm697_vm6 = vcmp.eq.f32.partialorder %v692_v38, 0.0 }
 0x20a   :  { %4258 = vrcp.f32 %v682_v39 }
 0x20b   :  { %3960 = vmatmul.mubr.msk.f32.vlgmr.msra.gmra.mrb[6].mxu0 %vm48_vm0, %v4511_v20 }
 0x20c   :  { %3981 = vmatprep.mubr.msk.f32.mxu0 %vm48_vm0, %v4520_v22 }
 0x20f   :  { %v4253_v40 = vpop.eup %4252 }
 0x210   :  { %v458_v41 = vmul.f32 %v4253_v40, %v456_v32  ;;  %v4255_v44 = vpop.eup %4254 }
 0x212   :  { %v460_v43 = vsel %vm459_vm3, %v456_v32, %v458_v41 }
 0x213   :  { %v463_v46 = vsel %vm461_vm4, %v462_v42, %v460_v43  ;;  %v4257_v47 = vpop.eup %4256 }
 0x214   :  { %v465_v48 = vmul.f32 %v4255_v44, %v463_v46  ;;  %v694_v49 = vmul.f32 %v4257_v47, %v692_v38  ;;  %v4259_v53 = vpop.eup %4258 }
 0x216   :  { %v3664_v50 = vclamps-f32 %v465_v48, 0.9999999  ;;  %v696_v52 = vsel %vm695_vm5, %v692_v38, %v694_v49  ;;  %v4186_v38 = vpack.c.bf16 %v3681_v35, %v3680_v34 }
 0x217   :  { %v699_v55 = vsel %vm697_vm6, %v698_v51, %v696_v52 }
 0x218   :  { %v469_v54 = vsub.f32 1.0, %v3664_v50  ;;  %v701_v56 = vmul.f32 %v4259_v53, %v699_v55  ;;  %v468_v60 = vadd.f32 1.0, %v3664_v50  ;;  %v3683_v50 = vld [vmem:[%s4969_s4 + $0x5] ss:$0 sm:$0xff] }
 0x21a   :  { %4260 = vrcp.f32 %v469_v54  ;;  %v3668_v57 = vclamps-f32 %v701_v56, 0.9999999 }
 0x21c   :  { %v705_v59 = vsub.f32 1.0, %v3668_v57  ;;  %v704_v63 = vadd.f32 1.0, %v3668_v57 }
 0x21e   :  { %4262 = vrcp.f32 %v705_v59  ;;  %v3686_v59 = vld [vmem:[%s4968_s3 + $0x120] sm:$0xff] }
 0x224   :  { %v4261_v61 = vpop.eup %4260 }
 0x225   :  { %v471_v62 = vmul.f32 %v4261_v61, %v468_v60  ;;  %v3687_v60 = vld [vmem:[%s4968_s3 + $0x128] sm:$0xff] }
 0x226   :  { %v4190_v61 = vpack.c.bf16 %v3687_v60, %v3686_v59 }
 0x227   :  { %4264 = vlog2.f32 %v471_v62  ;;  %v3688_v62 = vld [vmem:[%s4968_s3 + $0x130] sm:$0xff] }
 0x228   :  { %v4263_v0 = vpop.eup %4262  ;;  %4191 = vmatprep.subr.bf16.mxu0 %v4190_v61 }
 0x229   :  { %v707_v1 = vmul.f32 %v4263_v0, %v704_v63  ;;  %4193 = vmatpush3.bf16.msra.mxu0 %v4190_v61  ;;  %v3689_v63 = vld [vmem:[%s4968_s3 + $0x138] sm:$0xff] }
 0x22a   :  { %v4194_v0 = vpack.c.bf16 %v3689_v63, %v3688_v62 }
 0x22b   :  { %4266 = vlog2.f32 %v707_v1 }
 0x22c   :  { %4195 = vmatprep.subr.bf16.mxu0 %v4194_v0 }
 0x22d   :  { %4197 = vmatpush3.bf16.msra.mxu0 %v4194_v0  ;;  %v3694_v0 = vld [vmem:[%s4970_s5 + $0x8] sm:$0xff] }
 0x22e   :  { %3994 = vmatprep.subr.mxu0 %v4402_v23 }
 0x230   :  { %3982 = vmatmul.mubr.msk.f32.vlgmr.msra.gmra.mrb[8].mxu0 %vm48_vm0, %v4528_v24 }
 0x231   :  { %v4265_v2 = vpop.eup %4264  ;;  %3996 = vmatprep.mubr.msk.f32.mxu0 %vm4403_vm1, %v4402_v23  ;;  %3995 = vmatpush3.msra.mxu0 %v3694_v0 }
 0x232   :  { %v473_v3 = vmul.f32 0.6931472, %v4265_v2  ;;  %4004 = vmatprep.subr.mxu0 %v4402_v23 }
 0x234   :  { %v474_v4 = vsub.f32 0.0, %v473_v3 }
 0x235   :  { %v4267_v6 = vpop.eup %4266 }
 0x236   :  { %v475_v7 = vmul.f32 1.442695, %v474_v4  ;;  %v709_v8 = vmul.f32 0.6931472, %v4267_v6 }
 0x238   :  { %4268 = vpow2.f32 %v475_v7  ;;  %v710_v9 = vsub.f32 0.0, %v709_v8 }
 0x23a   :  { %v711_v10 = vmul.f32 1.442695, %v710_v9 }
 0x23c   :  { %4270 = vpow2.f32 %v711_v10 }
 0x242   :  { %v4269_v11 = vpop.eup %4268 }
 0x243   :  { %v477_v13 = vsel %vm319_vm2, %v4269_v11, 0.0 }
 0x244   :  { %478 = vadd.xlane.f32.xlu0 %v477_v13 }
 0x246   :  { %v4271_v14 = vpop.eup %4270 }
 0x247   :  { %v713_v15 = vsel %vm319_vm2, %v4271_v14, 0.0 }
 0x248   :  { %714 = vadd.xlane.f32.xlu1 %v713_v15 }
 0x2d1   :  { %v479_v27 = vpop.xlane.xlu0 %478 }
 0x2d2   :  { %4272 = vrcp.f32 %v479_v27 }
 0x2d5   :  { %v715_v28 = vpop.xlane.xlu1 %714 }
 0x2d6   :  { %4274 = vrcp.f32 %v715_v28 }
 0x2dc   :  { %v4273_v31 = vpop.eup %4272 }
 0x2dd   :  { %v481_v32 = vmul.f32 %v4273_v31, %v4269_v11 }
 0x2de   :  { %v3961_v39 = vpop.f32.mrb[6].mxu0 }
 0x2df   :  { %482 = vst.msk [vmem:[#allocation4] sm:$0xff] %vm319_vm2, %v481_v32  ;;  %3939 = vmatmul.mubr.msk.f32.vlgmr.msra.gmra.mrb[4].mxu1 %vm319_vm2, %v481_v32  ;;  %v872_v41 = vpop.f32.mrb[7].mxu0 }
 0x2e0   :  { %3947 = vmatpush3.msra.mxu1 %v4559_v45  ;;  %3948 = vmatprep.mubr.msk.f32.mxu1 %vm4403_vm1, %v4402_v23  ;;  %v4275_v36 = vpop.eup %4274  ;;  %v3675_v45 = vld [vmem:[%s4969_s4 + $0x1] ss:$0 sm:$0xff] }
 0x2e1   :  { %4183 = vmatprep.subr.bf16.mxu1 %v4182_v33  ;;  %v717_v37 = vmul.f32 %v4275_v36, %v4271_v14  ;;  %v4613_v40 = vadd.f32 %v3961_v39, %v3675_v45  ;;  %v873_v42 = vadd.f32 %v3675_v45, %v872_v41 }
 0x2e3   :  { %719 = vst.msk [vmem:[#allocation4 + $0x20] sm:$0xff] %vm319_vm2, %v717_v37  ;;  %3949 = vmatmul.mubr.msk.f32.vlgmr.msra.gmra.mrb[6].mxu1 %vm319_vm2, %v717_v37  ;;  %v1135_v43 = vmul.f32 %v873_v42, %v873_v42 }
 0x2e4   :  { %4185 = vmatpush3.bf16.msra.mxu1 %v4182_v33  ;;  %3970 = vmatprep.mubr.msk.f32.mxu1 %vm48_vm0, %v4468_v5 }
 0x2e5   :  { %4187 = vmatprep.subr.bf16.mxu1 %v4186_v38  ;;  %v1136_v44 = vsel %vm319_vm2, %v1135_v43, 0.0 }
 0x2e6   :  { %1137 = vadd.xlane.f32.xlu1 %v1136_v44 }
 0x2e8   :  { %4189 = vmatpush3.bf16.msra.mxu1 %v4186_v38 }
 0x2e9   :  { %3984 = vmatprep.subr.mxu1 %v4402_v23 }
 0x2eb   :  { %3971 = vmatmul.mubr.msk.f32.vlgmr.msra.gmra.mrb[8].mxu1 %vm48_vm0, %v4500_v17 }
 0x2ec   :  { %3986 = vmatprep.mubr.msk.f32.mxu1 %vm4403_vm1, %v4402_v23 }
 0x373   :  { %v1138_v8 = vpop.xlane.xlu1 %1137 }
 0x374   :  { %v1182_v10 = vsub.f32 1.0, %v1138_v8 }
 0x376   :  { %v1192_v15 = vmul.f32 %v1182_v10, %v1182_v10 }
 0x3b2   :  { %v4616_v46 = vpop.f32.mrb[4].mxu1 }
 0x3b3   :  { %v3940_v47 = vpop.f32.mrb[5].mxu1 }
 0x3b6   :  { %v4618_v48 = vpop.f32.mrb[6].mxu1 }
 0x3b7   :  { %v3950_v49 = vpop.f32.mrb[7].mxu1 }
 0x3be   :  { %v3972_v51 = vpop.f32.mrb[8].mxu1 }
 0x3bf   :  { %v4623_v52 = vadd.f32 %v3972_v51, %v3683_v50  ;;  %v960_v53 = vpop.f32.mrb[9].mxu1 }
 0x3c0   :  { %v961_v54 = vadd.f32 %v3683_v50, %v960_v53 }
 0x3c1   :  { %v1522_v51 = vmul.f32 %v4623_v52, %v4623_v52 }
 0x3c2   :  { %3985 = vmatpush3.xpose.msk.msra.mxu1 %vm319_vm2, %v961_v54  ;;  %v1139_v55 = vmul.f32 %v961_v54, %v961_v54  ;;  %v1518_v54 = vmul.f32 %v4613_v40, %v4613_v40 }
 0x3c3   :  { %3989 = vmatprep.subr.mxu1 %v4402_v23  ;;  %v1523_v53 = vsel %vm319_vm2, %v1522_v51, 0.0 }
 0x3c4   :  { %v1140_v56 = vsel %vm319_vm2, %v1139_v55, 0.0  ;;  %v1519_v55 = vsel %vm319_vm2, %v1518_v54, 0.0 }
 0x3c5   :  { %1141 = vadd.xlane.f32.xlu0 %v1140_v56  ;;  %3987 = vmatmul.mubr.msk.f32.vlgmr.msra.gmra.mrb[10].mxu1 %vm319_vm2, %v873_v42  ;;  %v3983_v56 = vpop.f32.mrb[8].mxu0 }
 0x3c6   :  { %3991 = vmatprep.mubr.msk.f32.mxu1 %vm4403_vm1, %v4402_v23  ;;  %v1048_v59 = vpop.f32.mrb[9].mxu0 }
 0x452   :  { %v1142_v57 = vpop.xlane.xlu0 %1141 }
 0x453   :  { %1143 = vxpose.xlu0.b32.start.end [1/1] (short) (narrow) %v1142_v57, 8  ;;  %v3691_v57 = vld [vmem:[%s4969_s4 + $0x9] ss:$0 sm:$0xff] }
 0x454   :  { %v1054_v60 = vadd.f32 %v3983_v56, %v3691_v57  ;;  %v1049_v61 = vadd.f32 %v3691_v57, %v1048_v59 }
 0x456   :  { %3990 = vmatpush3.msra.mxu1 %v1049_v61  ;;  %v3715_v61 = vld [vmem:[%s4968_s3 + $0xc0] sm:$0xff] }
 0x457   :  { %3999 = vmatprep.subr.mxu1 %v4402_v23 }
 0x498   :  { %v1131_v1 = vpop.f32.mrb[10].mxu1 }
 0x499   :  { %v3988_v2 = vpop.f32.mrb[11].mxu1  ;;  %v1175_v3 = vmul.f32 2.0, %v1131_v1 }
 0x49b   :  { %v1176_v4 = vsub.f32 1.0, %v1175_v3  ;;  %v4667_v3 = vld [vmem:[%s4970_s5] sm:$0xff] }
 0x4d3   :  { %v1159_v6 = vpop.trf.xlu0 }
 0x4d4   :  { %v1180_v7 = vrot.slane %v1159_v6, %v4562_v58 }
 0x4d6   :  { %v1181_v9 = vadd.f32 %v1180_v7, %v1176_v4  ;;  %v1183_v16 = vmul.f32 %v1180_v7, %v1138_v8  ;;  %v1193_v25 = vmul.f32 %v1192_v15, %v1180_v7 }
 0x4d8   :  { %v1186_v11 = vmul.f32 %v1181_v9, %v1181_v9  ;;  %v1188_v13 = vmul.f32 2.0, %v1181_v9  ;;  %v1184_v26 = vadd.f32 %v1183_v16, %v1176_v4 }
 0x4da   :  { %v1189_v14 = vmul.f32 %v1188_v13, %v1182_v10  ;;  %v1187_v18 = vmul.f32 %v1186_v11, %v1138_v8  ;;  %v1185_v29 = vmax.f32 %v1184_v26, 1e-15 }
 0x4dc   :  { %v1190_v19 = vmul.f32 %v1189_v14, %v1131_v1 }
 0x4de   :  { %v1191_v21 = vsub.f32 %v1187_v18, %v1190_v19 }
 0x4e0   :  { %v1194_v27 = vadd.f32 %v1193_v25, %v1191_v21 }
 0x4e2   :  { %v1195_v28 = vmax.f32 %v1194_v27, 0.0 }
 0x4e4   :  { %4276 = vrsqrt.f32 %v1195_v28  ;;  %vm1198_vm7 = vcmp.eq.f32.partialorder %v1195_v28, inf  ;;  %v1201_v32 = vand.u32 2147483648, %v1195_v28  ;;  %vm1200_vm8 = vcmp.eq.f32.partialorder %v1195_v28, 0.0 }
 0x4e5   :  { %4278 = vrcp.f32 %v1185_v29 }
 0x4ee   :  { %v4277_v30 = vpop.eup %4276 }
 0x4ef   :  { %v1197_v31 = vmul.f32 %v4277_v30, %v1195_v28  ;;  %v4279_v34 = vpop.eup %4278 }
 0x4f1   :  { %v1199_v33 = vsel %vm1198_vm7, %v1195_v28, %v1197_v31 }
 0x4f2   :  { %v1202_v35 = vsel %vm1200_vm8, %v1201_v32, %v1199_v33 }
 0x4f3   :  { %v1204_v36 = vmul.f32 %v4279_v34, %v1202_v35 }
 0x4f5   :  { %v3697_v37 = vclamps-f32 %v1204_v36, 0.9999999 }
 0x4f7   :  { %v1208_v38 = vsub.f32 1.0, %v3697_v37  ;;  %v1207_v45 = vadd.f32 1.0, %v3697_v37 }
 0x4f9   :  { %4280 = vrcp.f32 %v1208_v38 }
 0x503   :  { %v4281_v39 = vpop.eup %4280 }
 0x504   :  { %v1210_v41 = vmul.f32 %v4281_v39, %v1207_v45 }
 0x506   :  { %4282 = vlog2.f32 %v1210_v41 }
 0x510   :  { %v4283_v42 = vpop.eup %4282 }
 0x511   :  { %v1212_v43 = vmul.f32 0.6931472, %v4283_v42 }
 0x513   :  { %v1213_v44 = vsub.f32 0.0, %v1212_v43 }
 0x515   :  { %v1214_v47 = vmul.f32 1.442695, %v1213_v44 }
 0x517   :  { %4284 = vpow2.f32 %v1214_v47 }
 0x521   :  { %v4285_v49 = vpop.eup %4284 }
 0x522   :  { %v1216_v50 = vsel %vm319_vm2, %v4285_v49, 0.0 }
 0x523   :  { %1217 = vadd.xlane.f32.xlu1 %v1216_v50 }
 0x527   :  { %1524 = vadd.xlane.f32.xlu1 %v1523_v53 }
 0x52b   :  { %1520 = vadd.xlane.f32.xlu1 %v1519_v55 }
 0x5b0   :  { %v1218_v62 = vpop.xlane.xlu1 %1217 }
 0x5b1   :  { %4286 = vrcp.f32 %v1218_v62  ;;  %v3716_v62 = vld [vmem:[%s4968_s3 + $0xc8] sm:$0xff] }
 0x5b4   :  { %v1525_v63 = vpop.xlane.xlu1 %1524 }
 0x5b5   :  { %1526 = vxpose.xlu1.b32.start.end [1/1] (short) (narrow) %v1525_v63, 8 }
 0x5b8   :  { %v1521_v8 = vpop.xlane.xlu1 %1520 }
 0x5b9   :  { %v1565_v21 = vsub.f32 1.0, %v1521_v8 }
 0x5bb   :  { %v4287_v1 = vpop.eup %4286  ;;  %v1575_v27 = vmul.f32 %v1565_v21, %v1565_v21 }
 0x5bc   :  { %v1220_v2 = vmul.f32 %v4287_v1, %v4285_v49  ;;  %v4206_v1 = vpack.c.bf16 %v3716_v62, %v3715_v61 }
 0x5be   :  { %1222 = vst.msk [vmem:[#allocation4 + $0x8] sm:$0xff] %vm319_vm2, %v1220_v2  ;;  %3992 = vmatmul.mubr.msk.f32.vlgmr.msra.gmra.mrb[12].mxu1 %vm319_vm2, %v1220_v2  ;;  %v3717_v2 = vld [vmem:[%s4968_s3 + $0xd0] sm:$0xff] }
 0x5bf   :  { %4000 = vmatpush3.msra.mxu1 %v4667_v3  ;;  %4001 = vmatprep.mubr.msk.f32.mxu1 %vm4403_vm1, %v4402_v23 }
 0x5c0   :  { %4009 = vmatprep.subr.mxu1 %v4402_v23 }
 0x5c2   :  { %4002 = vmatmul.mubr.msk.f32.vlgmr.msra.gmra.mrb[14].mxu1 %vm319_vm2, %v4616_v46 }
 0x5c3   :  { %4010 = vmatpush3.msra.mxu1 %v1054_v60  ;;  %4011 = vmatprep.mubr.msk.f32.mxu1 %vm4403_vm1, %v4402_v23 }
 0x5c4   :  { %4019 = vmatprep.subr.mxu1 %v4402_v23 }
 0x691   :  { %v1292_v4 = vpop.f32.mrb[12].mxu1 }
 0x692   :  { %v3993_v6 = vpop.f32.mrb[13].mxu1  ;;  %3997 = vmatmul.mubr.msk.f32.vlgmr.msra.gmra.mrb[10].mxu0 %vm319_vm2, %v1292_v4  ;;  %v3718_v4 = vld [vmem:[%s4968_s3 + $0xd8] sm:$0xff] }
 0x693   :  { %4005 = vmatpush3.xpose.msk.msra.mxu0 %vm319_vm2, %v4623_v52  ;;  %4006 = vmatprep.mubr.msk.f32.mxu0 %vm4403_vm1, %v4402_v23  ;;  %v1542_v52 = vpop.trf.xlu1  ;;  %v4210_v6 = vpack.c.bf16 %v3718_v4, %v3717_v2 }
 0x694   :  { %4014 = vmatprep.subr.mxu0 %v4402_v23  ;;  %v1563_v16 = vrot.slane %v1542_v52, %v4562_v58 }
 0x695   :  { %v1438_v7 = vpop.f32.mrb[14].mxu1 }
 0x696   :  { %v4003_v46 = vpop.f32.mrb[15].mxu1  ;;  %4007 = vmatmul.mubr.msk.f32.vlgmr.msra.gmra.mrb[12].mxu0 %vm319_vm2, %v4613_v40  ;;  %v1566_v30 = vmul.f32 %v1563_v16, %v1521_v8  ;;  %v1576_v31 = vmul.f32 %v1575_v27, %v1563_v16 }
 0x697   :  { %4015 = vmatpush3.msra.mxu0 %v3694_v0  ;;  %4016 = vmatprep.mubr.msk.f32.mxu0 %vm4403_vm1, %v4402_v23 }
 0x765   :  { %v1365_v9 = vpop.f32.mrb[10].mxu0 }
 0x766   :  { %v4690_v10 = vadd.f32 %v1438_v7, %v1365_v9  ;;  %v3998_v11 = vpop.f32.mrb[11].mxu0 }
 0x769   :  { %v1514_v13 = vpop.f32.mrb[12].mxu0 }
 0x76a   :  { %v1558_v14 = vmul.f32 2.0, %v1514_v13  ;;  %v4008_v15 = vpop.f32.mrb[13].mxu0 }
 0x76c   :  { %v1559_v18 = vsub.f32 1.0, %v1558_v14 }
 0x76e   :  { %v1564_v19 = vadd.f32 %v1563_v16, %v1559_v18  ;;  %v1567_v33 = vadd.f32 %v1566_v30, %v1559_v18 }
 0x770   :  { %v1569_v25 = vmul.f32 %v1564_v19, %v1564_v19  ;;  %v1571_v40 = vmul.f32 2.0, %v1564_v19  ;;  %v1568_v36 = vmax.f32 %v1567_v33, 1e-15  ;;  %v3724_v33 = vld [vmem:[%s4968_s3 + $0x148] sm:$0xff] }
 0x772   :  { %v1572_v26 = vmul.f32 %v1571_v40, %v1565_v21  ;;  %v1570_v28 = vmul.f32 %v1569_v25, %v1521_v8  ;;  %v3712_v25 = vld [vmem:[%s4969_s4 + $0x2] ss:$0 sm:$0xff] }
 0x774   :  { %v1573_v29 = vmul.f32 %v1572_v26, %v1514_v13  ;;  %v3720_v13 = vld [vmem:[%s4969_s4 + $0x6] ss:$0 sm:$0xff] }
 0x776   :  { %v1574_v32 = vsub.f32 %v1570_v28, %v1573_v29 }
 0x778   :  { %v1577_v34 = vadd.f32 %v1576_v31, %v1574_v32  ;;  %v3723_v32 = vld [vmem:[%s4968_s3 + $0x140] sm:$0xff] }
 0x77a   :  { %v1578_v35 = vmax.f32 %v1577_v34, 0.0  ;;  %v4214_v34 = vpack.c.bf16 %v3724_v33, %v3723_v32 }
 0x77c   :  { %4288 = vrsqrt.f32 %v1578_v35  ;;  %vm1581_vm9 = vcmp.eq.f32.partialorder %v1578_v35, inf  ;;  %v1584_v45 = vand.u32 2147483648, %v1578_v35  ;;  %vm1583_vm10 = vcmp.eq.f32.partialorder %v1578_v35, 0.0 }
 0x77d   :  { %4290 = vrcp.f32 %v1568_v36  ;;  %v3726_v36 = vld [vmem:[%s4968_s3 + $0x158] sm:$0xff] }
 0x786   :  { %v4289_v37 = vpop.eup %4288 }
 0x787   :  { %v1580_v38 = vmul.f32 %v4289_v37, %v1578_v35  ;;  %v4291_v41 = vpop.eup %4290 }
 0x789   :  { %v1582_v39 = vsel %vm1581_vm9, %v1578_v35, %v1580_v38  ;;  %v3725_v35 = vld [vmem:[%s4968_s3 + $0x150] sm:$0xff] }
 0x78a   :  { %v1585_v42 = vsel %vm1583_vm10, %v1584_v45, %v1582_v39  ;;  %v4218_v37 = vpack.c.bf16 %v3726_v36, %v3725_v35 }
 0x78b   :  { %v1587_v43 = vmul.f32 %v4291_v41, %v1585_v42 }
 0x78d   :  { %v3703_v44 = vclamps-f32 %v1587_v43, 0.9999999 }
 0x78f   :  { %v1591_v47 = vsub.f32 1.0, %v3703_v44  ;;  %v1590_v49 = vadd.f32 1.0, %v3703_v44 }
 0x791   :  { %4292 = vrcp.f32 %v1591_v47 }
 0x79b   :  { %v4293_v50 = vpop.eup %4292 }
 0x79c   :  { %v1593_v51 = vmul.f32 %v4293_v50, %v1590_v49 }
 0x79e   :  { %4294 = vlog2.f32 %v1593_v51 }
 0x7a8   :  { %v4295_v53 = vpop.eup %4294 }
 0x7a9   :  { %v1595_v54 = vmul.f32 0.6931472, %v4295_v53 }
 0x7ab   :  { %v1596_v55 = vsub.f32 0.0, %v1595_v54 }
 0x7ad   :  { %v1597_v56 = vmul.f32 1.442695, %v1596_v55 }
 0x7af   :  { %4296 = vpow2.f32 %v1597_v56 }
 0x7b9   :  { %v4297_v57 = vpop.eup %4296 }
 0x7ba   :  { %v1599_v59 = vsel %vm319_vm2, %v4297_v57, 0.0 }
 0x7bb   :  { %1600 = vadd.xlane.f32.xlu0 %v1599_v59 }
 0x848   :  { %v1601_v60 = vpop.xlane.xlu0 %1600 }
 0x849   :  { %4298 = vrcp.f32 %v1601_v60 }
 0x853   :  { %v4299_v63 = vpop.eup %4298 }
 0x854   :  { %v1603_v0 = vmul.f32 %v4299_v63, %v4297_v57 }
 0x856   :  { %1605 = vst.msk [vmem:[#allocation4 + $0x28] sm:$0xff] %vm319_vm2, %v1603_v0  ;;  %4012 = vmatmul.mubr.msk.f32.vlgmr.msra.gmra.mrb[16].mxu1 %vm319_vm2, %v1603_v0 }
 0x857   :  { %4020 = vmatpush3.msra.mxu1 %v4667_v3  ;;  %4021 = vmatprep.mubr.msk.f32.mxu1 %vm4403_vm1, %v4402_v23  ;;  %v3707_v3 = vld [vmem:[%s4968_s3 + $0x40] sm:$0xff] }
 0x858   :  { %4207 = vmatprep.subr.bf16.mxu1 %v4206_v1 }
 0x85a   :  { %4022 = vmatmul.mubr.msk.f32.vlgmr.msra.gmra.mrb[18].mxu1 %vm319_vm2, %v4618_v48  ;;  %v3708_v48 = vld [vmem:[%s4968_s3 + $0x48] sm:$0xff] }
 0x85b   :  { %4209 = vmatpush3.bf16.msra.mxu1 %v4206_v1  ;;  %4043 = vmatprep.mubr.msk.f32.mxu1 %vm48_vm0, %v4468_v5  ;;  %v4198_v7 = vpack.c.bf16 %v3708_v48, %v3707_v3  ;;  %v3709_v5 = vld [vmem:[%s4968_s3 + $0x50] sm:$0xff] }
 0x85c   :  { %4211 = vmatprep.subr.bf16.mxu1 %v4210_v6 }
 0x85d   :  { %4199 = vmatprep.subr.bf16.mxu0 %v4198_v7 }
 0x85f   :  { %4213 = vmatpush3.bf16.msra.mxu1 %v4210_v6 }
 0x860   :  { %4057 = vmatprep.subr.mxu1 %v4402_v23 }
 0x862   :  { %4044 = vmatmul.mubr.msk.f32.vlgmr.msra.gmra.mrb[20].mxu1 %vm48_vm0, %v4500_v17  ;;  %v3710_v17 = vld [vmem:[%s4968_s3 + $0x58] sm:$0xff] }
 0x863   :  { %4059 = vmatprep.mubr.msk.f32.mxu1 %vm4403_vm1, %v4402_v23  ;;  %v4202_v46 = vpack.c.bf16 %v3710_v17, %v3709_v5 }
 0x929   :  { %v1675_v8 = vpop.f32.mrb[16].mxu1 }
 0x92a   :  { %v4013_v9 = vpop.f32.mrb[17].mxu1  ;;  %4017 = vmatmul.mubr.msk.f32.vlgmr.msra.gmra.mrb[14].mxu0 %vm319_vm2, %v1675_v8 }
 0x92b   :  { %4201 = vmatpush3.bf16.msra.mxu0 %v4198_v7  ;;  %4032 = vmatprep.mubr.msk.f32.mxu0 %vm48_vm0, %v4487_v12 }
 0x92c   :  { %4203 = vmatprep.subr.bf16.mxu0 %v4202_v46 }
 0x92d   :  { %v1821_v11 = vpop.f32.mrb[18].mxu1 }
 0x92e   :  { %v4023_v52 = vpop.f32.mrb[19].mxu1 }
 0x92f   :  { %4205 = vmatpush3.bf16.msra.mxu0 %v4202_v46 }
 0x930   :  { %4215 = vmatprep.subr.bf16.mxu0 %v4214_v34 }
 0x932   :  { %4033 = vmatmul.mubr.msk.f32.vlgmr.msra.gmra.mrb[16].mxu0 %vm48_vm0, %v4511_v20 }
 0x933   :  { %4054 = vmatprep.mubr.msk.f32.mxu0 %vm48_vm0, %v4520_v22  ;;  %4217 = vmatpush3.bf16.msra.mxu0 %v4214_v34 }
 0x934   :  { %4219 = vmatprep.subr.bf16.mxu0 %v4218_v37 }
 0x935   :  { %v4045_v14 = vpop.f32.mrb[20].mxu1 }
 0x936   :  { %v4742_v15 = vadd.f32 %v4045_v14, %v3720_v13  ;;  %v1992_v16 = vpop.f32.mrb[21].mxu1 }
 0x937   :  { %v1993_v18 = vadd.f32 %v3720_v13, %v1992_v16  ;;  %4221 = vmatpush3.bf16.msra.mxu0 %v4218_v37 }
 0x938   :  { %4067 = vmatprep.subr.mxu0 %v4402_v23 }
 0x939   :  { %v2171_v12 = vmul.f32 %v1993_v18, %v1993_v18  ;;  %4058 = vmatpush3.xpose.msk.msra.mxu1 %vm319_vm2, %v1993_v18  ;;  %v2482_v18 = vmul.f32 %v4742_v15, %v4742_v15 }
 0x93a   :  { %4062 = vmatprep.subr.mxu1 %v4402_v23  ;;  %4055 = vmatmul.mubr.msk.f32.vlgmr.msra.gmra.mrb[18].mxu0 %vm48_vm0, %v4528_v24 }
 0x93b   :  { %v2172_v19 = vsel %vm319_vm2, %v2171_v12, 0.0  ;;  %4069 = vmatprep.mubr.msk.f32.mxu0 %vm4403_vm1, %v4402_v23  ;;  %v2483_v12 = vsel %vm319_vm2, %v2482_v18, 0.0 }
 0x93c   :  { %2173 = vadd.xlane.f32.xlu1 %v2172_v19 }
 0x9c9   :  { %v2174_v31 = vpop.xlane.xlu1 %2173 }
 0x9fd   :  { %v1748_v20 = vpop.f32.mrb[14].mxu0 }
 0x9fe   :  { %v4747_v21 = vadd.f32 %v1821_v11, %v1748_v20  ;;  %v4018_v22 = vpop.f32.mrb[15].mxu0 }
 0xa05   :  { %v4034_v40 = vpop.f32.mrb[16].mxu0 }
 0xa06   :  { %v4752_v26 = vadd.f32 %v4034_v40, %v3712_v25  ;;  %v1904_v27 = vpop.f32.mrb[17].mxu0 }
 0xa07   :  { %v1905_v28 = vadd.f32 %v3712_v25, %v1904_v27  ;;  %v3728_v25 = vld [vmem:[%s4969_s4 + $0xa] ss:$0 sm:$0xff] }
 0xa08   :  { %v2478_v19 = vmul.f32 %v4752_v26, %v4752_v26 }
 0xa09   :  { %4060 = vmatmul.mubr.msk.f32.vlgmr.msra.gmra.mrb[22].mxu1 %vm319_vm2, %v1905_v28  ;;  %v2167_v29 = vmul.f32 %v1905_v28, %v1905_v28 }
 0xa0a   :  { %4064 = vmatprep.mubr.msk.f32.mxu1 %vm4403_vm1, %v4402_v23  ;;  %v2479_v20 = vsel %vm319_vm2, %v2478_v19, 0.0  ;;  %v4348_v19 = vld [vmem:[%s4965_s0] sm:$0xff] }
 0xa0b   :  { %v2168_v30 = vsel %vm319_vm2, %v2167_v29, 0.0 }
 0xa0c   :  { %2169 = vadd.xlane.f32.xlu0 %v2168_v30 }
 0xa0d   :  { %v4056_v22 = vpop.f32.mrb[18].mxu0 }
 0xa0e   :  { %v2080_v40 = vpop.f32.mrb[19].mxu0  ;;  %v2086_v27 = vadd.f32 %v4056_v22, %v3728_v25 }
 0xa0f   :  { %v2081_v28 = vadd.f32 %v3728_v25, %v2080_v40  ;;  %v3742_v25 = vld [vmem:[%s4968_s3 + $0x60] sm:$0xff]  ;;  %v3743_v40 = vld [vmem:[%s4968_s3 + $0x68] sm:$0xff] }
 0xa11   :  { %4063 = vmatpush3.msra.mxu1 %v2081_v28  ;;  %v4222_v28 = vpack.c.bf16 %v3743_v40, %v3742_v25 }
 0xa12   :  { %4072 = vmatprep.subr.mxu1 %v4402_v23 }
 0xa39   :  { %2175 = vxpose.xlu0.b32.start.end [1/1] (short) (narrow) %v2174_v31, 8  ;;  %v3731_v31 = vld [vmem:[%s4970_s5 + $0x10] sm:$0xff] }
 0xa3a   :  { %4068 = vmatpush3.msra.mxu0 %v3731_v31 }
 0xa3b   :  { %4077 = vmatprep.subr.mxu0 %v4402_v23 }
 0xa99   :  { %v2170_v38 = vpop.xlane.xlu0 %2169 }
 0xa9a   :  { %v2214_v49 = vsub.f32 1.0, %v2170_v38 }
 0xa9c   :  { %v2224_v54 = vmul.f32 %v2214_v49, %v2214_v49 }
 0xab9   :  { %v2191_v45 = vpop.trf.xlu0 }
 0xaba   :  { %v2212_v43 = vrot.slane %v2191_v45, %v4562_v58 }
 0xabc   :  { %v2215_v24 = vmul.f32 %v2212_v43, %v2170_v38  ;;  %v2225_v57 = vmul.f32 %v2224_v54, %v2212_v43 }
 0xadc   :  { %v2163_v39 = vpop.f32.mrb[22].mxu1 }
 0xadd   :  { %v2207_v41 = vmul.f32 2.0, %v2163_v39  ;;  %v4061_v42 = vpop.f32.mrb[23].mxu1 }
 0xadf   :  { %v2208_v44 = vsub.f32 1.0, %v2207_v41 }
 0xae1   :  { %v2213_v47 = vadd.f32 %v2212_v43, %v2208_v44  ;;  %v2216_v60 = vadd.f32 %v2215_v24, %v2208_v44 }
 0xae3   :  { %v2218_v50 = vmul.f32 %v2213_v47, %v2213_v47  ;;  %v2220_v51 = vmul.f32 2.0, %v2213_v47  ;;  %v2217_v63 = vmax.f32 %v2216_v60, 1e-15 }
 0xae5   :  { %v2221_v53 = vmul.f32 %v2220_v51, %v2214_v49  ;;  %v2219_v55 = vmul.f32 %v2218_v50, %v2170_v38 }
 0xae7   :  { %v2222_v56 = vmul.f32 %v2221_v53, %v2163_v39 }
 0xae9   :  { %v2223_v59 = vsub.f32 %v2219_v55, %v2222_v56 }
 0xaeb   :  { %v2226_v61 = vadd.f32 %v2225_v57, %v2223_v59 }
 0xaed   :  { %v2227_v62 = vmax.f32 %v2226_v61, 0.0 }
 0xaef   :  { %4300 = vrsqrt.f32 %v2227_v62  ;;  %vm2230_vm11 = vcmp.eq.f32.partialorder %v2227_v62, inf  ;;  %v2233_v2 = vand.u32 2147483648, %v2227_v62  ;;  %vm2232_vm12 = vcmp.eq.f32.partialorder %v2227_v62, 0.0 }
 0xaf0   :  { %4302 = vrcp.f32 %v2217_v63 }
 0xaf9   :  { %v4301_v0 = vpop.eup %4300 }
 0xafa   :  { %v2229_v1 = vmul.f32 %v4301_v0, %v2227_v62  ;;  %v4303_v6 = vpop.eup %4302 }
 0xafc   :  { %v2231_v4 = vsel %vm2230_vm11, %v2227_v62, %v2229_v1 }
 0xafd   :  { %v2234_v3 = vsel %vm2232_vm12, %v2233_v2, %v2231_v4 }
 0xafe   :  { %v2236_v48 = vmul.f32 %v4303_v6, %v2234_v3 }
 0xb00   :  { %v3734_v7 = vclamps-f32 %v2236_v48, 0.9999999 }
 0xb02   :  { %v2240_v5 = vsub.f32 1.0, %v3734_v7  ;;  %v2239_v17 = vadd.f32 1.0, %v3734_v7 }
 0xb04   :  { %4304 = vrcp.f32 %v2240_v5 }
 0xb0e   :  { %v4305_v46 = vpop.eup %4304 }
 0xb0f   :  { %v2242_v8 = vmul.f32 %v4305_v46, %v2239_v17 }
 0xb11   :  { %4306 = vlog2.f32 %v2242_v8 }
 0xb1b   :  { %v4307_v9 = vpop.eup %4306 }
 0xb1c   :  { %v2244_v11 = vmul.f32 0.6931472, %v4307_v9 }
 0xb1e   :  { %v2245_v52 = vsub.f32 0.0, %v2244_v11 }
 0xb20   :  { %v2246_v13 = vmul.f32 1.442695, %v2245_v52 }
 0xb22   :  { %4308 = vpow2.f32 %v2246_v13 }
 0xb2c   :  { %v4309_v14 = vpop.eup %4308 }
 0xb2d   :  { %v2248_v16 = vsel %vm319_vm2, %v4309_v14, 0.0 }
 0xb2e   :  { %2249 = vadd.xlane.f32.xlu1 %v2248_v16 }
 0xb32   :  { %2484 = vadd.xlane.f32.xlu1 %v2483_v12 }
 0xb36   :  { %2480 = vadd.xlane.f32.xlu1 %v2479_v20  ;;  %v3751_v20 = vld [vmem:[%s4968_s3 + $0xe8] sm:$0xff] }
 0xbbb   :  { %v2250_v29 = vpop.xlane.xlu1 %2249 }
 0xbbc   :  { %4310 = vrcp.f32 %v2250_v29  ;;  %v3745_v29 = vld [vmem:[%s4968_s3 + $0x78] sm:$0xff] }
 0xbbf   :  { %v2485_v30 = vpop.xlane.xlu1 %2484 }
 0xbc0   :  { %2486 = vxpose.xlu1.b32.start.end [1/1] (short) (narrow) %v2485_v30, 8 }
 0xbc3   :  { %v2481_v34 = vpop.xlane.xlu1 %2480 }
 0xbc4   :  { %v2525_v42 = vsub.f32 1.0, %v2481_v34 }
 0xbc6   :  { %v4311_v32 = vpop.eup %4310  ;;  %v2535_v49 = vmul.f32 %v2525_v42, %v2525_v42 }
 0xbc7   :  { %v2252_v33 = vmul.f32 %v4311_v32, %v4309_v14  ;;  %v4350_v32 = vld [vmem:[%s4967_s2] sm:$0xff] }
 0xbc9   :  { %2254 = vst.msk [vmem:[#allocation4 + $0x10] sm:$0xff] %vm319_vm2, %v2252_v33  ;;  %4065 = vmatmul.mubr.msk.f32.vlgmr.msra.gmra.mrb[24].mxu1 %vm319_vm2, %v2252_v33  ;;  %v3752_v33 = vld [vmem:[%s4968_s3 + $0xf0] sm:$0xff] }
 0xbca   :  { %4073 = vmatpush3.xpose.msk.msra.mxu1 %vm319_vm2, %v4742_v15  ;;  %4074 = vmatprep.mubr.msk.f32.mxu1 %vm4403_vm1, %v4402_v23 }
 0xbcb   :  { %4082 = vmatprep.subr.mxu1 %v4402_v23 }
 0xbcd   :  { %4075 = vmatmul.mubr.msk.f32.vlgmr.msra.gmra.mrb[26].mxu1 %vm319_vm2, %v4752_v26 }
 0xbce   :  { %4083 = vmatpush3.msra.mxu1 %v3731_v31  ;;  %4084 = vmatprep.mubr.msk.f32.mxu1 %vm4403_vm1, %v4402_v23  ;;  %v4349_v31 = vld [vmem:[%s4965_s0 + $0x8] sm:$0xff] }
 0xc40   :  { %v2502_v15 = vpop.trf.xlu1 }
 0xc41   :  { %v2523_v39 = vrot.slane %v2502_v15, %v4562_v58 }
 0xc43   :  { %v2526_v53 = vmul.f32 %v2523_v39, %v2481_v34  ;;  %v2536_v54 = vmul.f32 %v2535_v49, %v2523_v39 }
 0xc9c   :  { %v2324_v35 = vpop.f32.mrb[24].mxu1 }
 0xc9d   :  { %v4066_v36 = vpop.f32.mrb[25].mxu1  ;;  %4070 = vmatmul.mubr.msk.f32.vlgmr.msra.gmra.mrb[20].mxu0 %vm319_vm2, %v2324_v35 }
 0xc9e   :  { %4078 = vmatpush3.msra.mxu0 %v2086_v27  ;;  %4079 = vmatprep.mubr.msk.f32.mxu0 %vm4403_vm1, %v4402_v23  ;;  %v3744_v27 = vld [vmem:[%s4968_s3 + $0x70] sm:$0xff] }
 0xc9f   :  { %v4226_v30 = vpack.c.bf16 %v3745_v29, %v3744_v27  ;;  %4223 = vmatprep.subr.bf16.mxu0 %v4222_v28 }
 0xca0   :  { %v2474_v37 = vpop.f32.mrb[26].mxu1 }
 0xca1   :  { %v2518_v38 = vmul.f32 2.0, %v2474_v37  ;;  %v4076_v45 = vpop.f32.mrb[27].mxu1 }
 0xca2   :  { %v3747_v45 = vld [vmem:[%s4969_s4 + $0x3] ss:$0 sm:$0xff] }
 0xca3   :  { %v2519_v26 = vsub.f32 1.0, %v2518_v38  ;;  %v4352_v38 = vld [vmem:[%s4966_s1 + $0x8] sm:$0xff] }
 0xca5   :  { %v2524_v41 = vadd.f32 %v2523_v39, %v2519_v26  ;;  %v2527_v56 = vadd.f32 %v2526_v53, %v2519_v26 }
 0xca7   :  { %v2529_v43 = vmul.f32 %v2524_v41, %v2524_v41  ;;  %v2531_v44 = vmul.f32 2.0, %v2524_v41  ;;  %v2528_v59 = vmax.f32 %v2527_v56, 1e-15 }
 0xca9   :  { %v2532_v47 = vmul.f32 %v2531_v44, %v2525_v42  ;;  %v2530_v50 = vmul.f32 %v2529_v43, %v2481_v34  ;;  %v3753_v34 = vld [vmem:[%s4968_s3 + $0xf8] sm:$0xff] }
 0xcaa   :  { %v4234_v35 = vpack.c.bf16 %v3753_v34, %v3752_v33 }
 0xcab   :  { %v2533_v51 = vmul.f32 %v2532_v47, %v2474_v37  ;;  %v4351_v37 = vld [vmem:[%s4966_s1] sm:$0xff] }
 0xcad   :  { %v2534_v55 = vsub.f32 %v2530_v50, %v2533_v51  ;;  %v3755_v51 = vld [vmem:[%s4969_s4 + $0x7] ss:$0 sm:$0xff] }
 0xcaf   :  { %v2537_v24 = vadd.f32 %v2536_v54, %v2534_v55 }
 0xcb1   :  { %v2538_v57 = vmax.f32 %v2537_v24, 0.0 }
 0xcb3   :  { %4312 = vrsqrt.f32 %v2538_v57  ;;  %vm2541_vm13 = vcmp.eq.f32.partialorder %v2538_v57, inf  ;;  %v2544_v62 = vand.u32 2147483648, %v2538_v57  ;;  %vm2543_vm14 = vcmp.eq.f32.partialorder %v2538_v57, 0.0 }
 0xcb4   :  { %4314 = vrcp.f32 %v2528_v59  ;;  %v3758_v59 = vld [vmem:[%s4968_s3 + $0x160] sm:$0xff] }
 0xcbd   :  { %v4313_v60 = vpop.eup %4312 }
 0xcbe   :  { %v2540_v61 = vmul.f32 %v4313_v60, %v2538_v57  ;;  %v4315_v0 = vpop.eup %4314  ;;  %v3759_v60 = vld [vmem:[%s4968_s3 + $0x168] sm:$0xff] }
 0xcc0   :  { %v2542_v63 = vsel %vm2541_vm13, %v2538_v57, %v2540_v61  ;;  %v4238_v61 = vpack.c.bf16 %v3759_v60, %v3758_v59  ;;  %v3766_v59 = vld [vmem:[%s4970_s5 + $0x18] sm:$0xff] }
 0xcc1   :  { %v2545_v1 = vsel %vm2543_vm14, %v2544_v62, %v2542_v63  ;;  %v3760_v62 = vld [vmem:[%s4968_s3 + $0x170] sm:$0xff]  ;;  %v3761_v63 = vld [vmem:[%s4968_s3 + $0x178] sm:$0xff] }
 0xcc2   :  { %v2547_v2 = vmul.f32 %v4315_v0, %v2545_v1  ;;  %v4242_v0 = vpack.c.bf16 %v3761_v63, %v3760_v62  ;;  %v4353_v1 = vld [vmem:[%s4967_s2 + $0x8] sm:$0xff] }
 0xcc4   :  { %v3739_v4 = vclamps-f32 %v2547_v2, 0.9999999 }
 0xcc6   :  { %v2551_v6 = vsub.f32 1.0, %v3739_v4  ;;  %v2550_v3 = vadd.f32 1.0, %v3739_v4 }
 0xcc8   :  { %4316 = vrcp.f32 %v2551_v6 }
 0xcd2   :  { %v4317_v48 = vpop.eup %4316 }
 0xcd3   :  { %v2553_v7 = vmul.f32 %v4317_v48, %v2550_v3 }
 0xcd5   :  { %4318 = vlog2.f32 %v2553_v7 }
 0xcdf   :  { %v4319_v5 = vpop.eup %4318 }
 0xce0   :  { %v2555_v17 = vmul.f32 0.6931472, %v4319_v5 }
 0xce2   :  { %v2556_v46 = vsub.f32 0.0, %v2555_v17 }
 0xce4   :  { %v2557_v8 = vmul.f32 1.442695, %v2556_v46 }
 0xce6   :  { %4320 = vpow2.f32 %v2557_v8 }
 0xcf0   :  { %v4321_v9 = vpop.eup %4320 }
 0xcf1   :  { %v2559_v11 = vsel %vm319_vm2, %v4321_v9, 0.0 }
 0xcf2   :  { %2560 = vadd.xlane.f32.xlu0 %v2559_v11 }
 0xd70   :  { %v2397_v52 = vpop.f32.mrb[20].mxu0 }
 0xd71   :  { %v4808_v13 = vadd.f32 %v2397_v52, %v4690_v10  ;;  %v4071_v14 = vpop.f32.mrb[21].mxu0  ;;  %v3750_v10 = vld [vmem:[%s4968_s3 + $0xe0] sm:$0xff] }
 0xd72   :  { %v4230_v22 = vpack.c.bf16 %v3751_v20, %v3750_v10 }
 0xd74   :  { %4231 = vmatprep.subr.bf16.mxu1 %v4230_v22 }
 0xd7f   :  { %v2561_v16 = vpop.xlane.xlu0 %2560 }
 0xd80   :  { %4322 = vrcp.f32 %v2561_v16 }
 0xd8a   :  { %v4323_v18 = vpop.eup %4322 }
 0xd8b   :  { %v2563_v12 = vmul.f32 %v4323_v18, %v4321_v9 }
 0xd8d   :  { %2565 = vst.msk [vmem:[#allocation4 + $0x30] sm:$0xff] %vm319_vm2, %v2563_v12  ;;  %4080 = vmatmul.mubr.msk.f32.vlgmr.msra.gmra.mrb[22].mxu0 %vm319_vm2, %v2563_v12 }
 0xd8e   :  { %4095 = vmatprep.mubr.msk.f32.mxu0 %vm48_vm0, %v4348_v19  ;;  %4225 = vmatpush3.bf16.msra.mxu0 %v4222_v28 }
 0xd8f   :  { %4227 = vmatprep.subr.bf16.mxu0 %v4226_v30 }
 0xd92   :  { %4229 = vmatpush3.bf16.msra.mxu0 %v4226_v30 }
 0xd93   :  { %4239 = vmatprep.subr.bf16.mxu0 %v4238_v61 }
 0xd95   :  { %4096 = vmatmul.mubr.msk.f32.vlgmr.msra.gmra.mrb[24].mxu0 %vm48_vm0, %v4349_v31 }
 0xd96   :  { %4117 = vmatprep.mubr.msk.f32.mxu0 %vm48_vm0, %v4350_v32  ;;  %4241 = vmatpush3.bf16.msra.mxu0 %v4238_v61 }
 0xd97   :  { %4243 = vmatprep.subr.bf16.mxu0 %v4242_v0 }
 0xd9a   :  { %4245 = vmatpush3.bf16.msra.mxu0 %v4242_v0 }
 0xd9b   :  { %4130 = vmatprep.subr.mxu0 %v4402_v23 }
 0xd9d   :  { %4118 = vmatmul.mubr.msk.f32.vlgmr.msra.gmra.mrb[26].mxu0 %vm48_vm0, %v4353_v1 }
 0xd9e   :  { %4132 = vmatprep.mubr.msk.f32.mxu0 %vm4403_vm1, %v4402_v23  ;;  %4131 = vmatpush3.msra.mxu0 %v3766_v59 }
 0xd9f   :  { %4140 = vmatprep.subr.mxu0 %v4402_v23 }
 0xe60   :  { %v2635_v36 = vpop.f32.mrb[22].mxu0 }
 0xe61   :  { %v4081_v15 = vpop.f32.mrb[23].mxu0  ;;  %4085 = vmatmul.mubr.msk.f32.vlgmr.msra.gmra.mrb[28].mxu1 %vm319_vm2, %v2635_v36 }
 0xe62   :  { %4233 = vmatpush3.bf16.msra.mxu1 %v4230_v22  ;;  %4106 = vmatprep.mubr.msk.f32.mxu1 %vm48_vm0, %v4351_v37 }
 0xe63   :  { %4235 = vmatprep.subr.bf16.mxu1 %v4234_v35 }
 0xe66   :  { %4237 = vmatpush3.bf16.msra.mxu1 %v4234_v35 }
 0xe67   :  { %4120 = vmatprep.subr.mxu1 %v4402_v23 }
 0xe68   :  { %v4097_v39 = vpop.f32.mrb[24].mxu0 }
 0xe69   :  { %4107 = vmatmul.mubr.msk.f32.vlgmr.msra.gmra.mrb[30].mxu1 %vm48_vm0, %v4352_v38  ;;  %v4863_v26 = vadd.f32 %v4097_v39, %v3747_v45  ;;  %v2792_v41 = vpop.f32.mrb[25].mxu0 }
 0xe6a   :  { %4122 = vmatprep.mubr.msk.f32.mxu1 %vm4403_vm1, %v4402_v23  ;;  %v2793_v42 = vadd.f32 %v3747_v45, %v2792_v41 }
 0xe6c   :  { %v3055_v43 = vmul.f32 %v2793_v42, %v2793_v42 }
 0xe6e   :  { %v3056_v44 = vsel %vm319_vm2, %v3055_v43, 0.0 }
 0xe6f   :  { %3057 = vadd.xlane.f32.xlu0 %v3056_v44 }
 0xefc   :  { %v3058_v3 = vpop.xlane.xlu0 %3057 }
 0xefd   :  { %v3102_v46 = vsub.f32 1.0, %v3058_v3 }
 0xeff   :  { %v3112_v52 = vmul.f32 %v3102_v46, %v3102_v46 }
 0xf34   :  { %v2708_v47 = vpop.f32.mrb[28].mxu1 }
 0xf35   :  { %v4867_v49 = vadd.f32 %v2708_v47, %v4747_v21  ;;  %v4086_v50 = vpop.f32.mrb[29].mxu1  ;;  %v3366_v47 = vmul.f32 %v4863_v26, %v4863_v26 }
 0xf37   :  { %v3367_v50 = vsel %vm319_vm2, %v3366_v47, 0.0 }
 0xf3c   :  { %v4108_v53 = vpop.f32.mrb[30].mxu1 }
 0xf3d   :  { %v4872_v54 = vadd.f32 %v4108_v53, %v3755_v51  ;;  %v2880_v55 = vpop.f32.mrb[31].mxu1  ;;  %v3763_v53 = vld [vmem:[%s4969_s4 + $0xb] ss:$0 sm:$0xff] }
 0xf3e   :  { %v2881_v56 = vadd.f32 %v3755_v51, %v2880_v55  ;;  %v4119_v51 = vpop.f32.mrb[26].mxu0 }
 0xf3f   :  { %v3370_v43 = vmul.f32 %v4872_v54, %v4872_v54  ;;  %v2968_v55 = vpop.f32.mrb[27].mxu0 }
 0xf40   :  { %4121 = vmatpush3.xpose.msk.msra.mxu1 %vm319_vm2, %v2881_v56  ;;  %v3059_v24 = vmul.f32 %v2881_v56, %v2881_v56  ;;  %v2974_v56 = vadd.f32 %v4119_v51, %v3763_v53 }
 0xf41   :  { %4125 = vmatprep.subr.mxu1 %v4402_v23  ;;  %v3371_v44 = vsel %vm319_vm2, %v3370_v43, 0.0 }
 0xf42   :  { %v3060_v57 = vsel %vm319_vm2, %v3059_v24, 0.0  ;;  %v2969_v24 = vadd.f32 %v3763_v53, %v2968_v55 }
 0xf43   :  { %3061 = vadd.xlane.f32.xlu1 %v3060_v57  ;;  %4123 = vmatmul.mubr.msk.f32.vlgmr.msra.gmra.mrb[32].mxu1 %vm319_vm2, %v2793_v42 }
 0xf44   :  { %4127 = vmatprep.mubr.msk.f32.mxu1 %vm4403_vm1, %v4402_v23  ;;  %4126 = vmatpush3.msra.mxu1 %v2969_v24 }
 0xf45   :  { %4135 = vmatprep.subr.mxu1 %v4402_v23 }
 0xfd0   :  { %v3062_v21 = vpop.xlane.xlu1 %3061 }
 0xfd1   :  { %3063 = vxpose.xlu0.b32.start.end [1/1] (short) (narrow) %v3062_v21, 8 }
0x1016   :  { %v3051_v2 = vpop.f32.mrb[32].mxu1 }
0x1017   :  { %v4124_v4 = vpop.f32.mrb[33].mxu1  ;;  %v3095_v6 = vmul.f32 2.0, %v3051_v2 }
0x1019   :  { %v3096_v48 = vsub.f32 1.0, %v3095_v6 }
0x1051   :  { %v3079_v7 = vpop.trf.xlu0 }
0x1052   :  { %v3100_v5 = vrot.slane %v3079_v7, %v4562_v58 }
0x1054   :  { %v3101_v17 = vadd.f32 %v3100_v5, %v3096_v48  ;;  %v3103_v14 = vmul.f32 %v3100_v5, %v3058_v3  ;;  %v3113_v19 = vmul.f32 %v3112_v52, %v3100_v5 }
0x1056   :  { %v3106_v8 = vmul.f32 %v3101_v17, %v3101_v17  ;;  %v3108_v9 = vmul.f32 2.0, %v3101_v17  ;;  %v3104_v10 = vadd.f32 %v3103_v14, %v3096_v48 }
0x1058   :  { %v3109_v11 = vmul.f32 %v3108_v9, %v3102_v46  ;;  %v3107_v16 = vmul.f32 %v3106_v8, %v3058_v3  ;;  %v3105_v25 = vmax.f32 %v3104_v10, 1e-15 }
0x105a   :  { %v3110_v18 = vmul.f32 %v3109_v11, %v3051_v2 }
0x105c   :  { %v3111_v12 = vsub.f32 %v3107_v16, %v3110_v18 }
0x105e   :  { %v3114_v20 = vadd.f32 %v3113_v19, %v3111_v12 }
0x1060   :  { %v3115_v22 = vmax.f32 %v3114_v20, 0.0 }
0x1062   :  { %4324 = vrsqrt.f32 %v3115_v22  ;;  %vm3118_vm15 = vcmp.eq.f32.partialorder %v3115_v22, inf  ;;  %v3121_v28 = vand.u32 2147483648, %v3115_v22  ;;  %vm3120_vm3 = vcmp.eq.f32.partialorder %v3115_v22, 0.0 }
0x1063   :  { %4326 = vrcp.f32 %v3105_v25 }
0x106c   :  { %v4325_v40 = vpop.eup %4324 }
0x106d   :  { %v3117_v27 = vmul.f32 %v4325_v40, %v3115_v22  ;;  %v4327_v30 = vpop.eup %4326 }
0x106f   :  { %v3119_v29 = vsel %vm3118_vm15, %v3115_v22, %v3117_v27 }
0x1070   :  { %v3122_v31 = vsel %vm3120_vm3, %v3121_v28, %v3119_v29 }
0x1071   :  { %v3124_v32 = vmul.f32 %v4327_v30, %v3122_v31 }
0x1073   :  { %v3769_v33 = vclamps-f32 %v3124_v32, 0.9999999 }
0x1075   :  { %v3128_v34 = vsub.f32 1.0, %v3769_v33  ;;  %v3127_v35 = vadd.f32 1.0, %v3769_v33 }
0x1077   :  { %4328 = vrcp.f32 %v3128_v34 }
0x1081   :  { %v4329_v36 = vpop.eup %4328 }
0x1082   :  { %v3130_v15 = vmul.f32 %v4329_v36, %v3127_v35 }
0x1084   :  { %4330 = vlog2.f32 %v3130_v15 }
0x108e   :  { %v4331_v37 = vpop.eup %4330 }
0x108f   :  { %v3132_v38 = vmul.f32 0.6931472, %v4331_v37  ;;  %v3777_v37 = vld [vmem:[%s4971_s6] ss:$0 sm:$0xff]  ;;  %s4404_s6 = smov [#allocation4]  }
0x1090   :  { %s3628_s21 = sshll.u32 %s4404_s6, 4  ;;  %s3629_s21 = int_to_ptr.vmem [resolvable:$true] %s3628_s21 }
0x1091   :  { %v3133_v45 = vsub.f32 0.0, %v3132_v38  ;;  %s4354_s22 = scalar_lea.vmem %s3629_s21, 1024  ;;  %p4359_p1 = scmp.lt.s32.totalorder %s3629_s21, %s3629_s21 }
0x1092   :  { %p4355_p0 = scmp.ne.s32.totalorder %s3629_s21, %s4354_s22  ;;  %p4360_p2 = scmp.lt.s32.totalorder %s4354_s22, %s4354_s22 }
0x1093   :  { %v3134_v39 = vmul.f32 1.442695, %v3133_v45 }
0x1094   :  { %p4361_p3 = por %p4360_p2, %p4359_p1 }
0x1095   :  { %4332 = vpow2.f32 %v3134_v39 }
0x1096   :  { %p4362_p4 = pnand %p4361_p3, %p4355_p0 }
0x109f   :  { %v4333_v41 = vpop.eup %4332 }
0x10a0   :  { %v3136_v42 = vsel %vm319_vm2, %v4333_v41, 0.0 }
0x10a1   :  { %3137 = vadd.xlane.f32.xlu1 %v3136_v42 }
0x10a5   :  { %3372 = vadd.xlane.f32.xlu1 %v3371_v44 }
0x10a9   :  { %3368 = vadd.xlane.f32.xlu1 %v3367_v50 }
0x112e   :  { %v3138_v57 = vpop.xlane.xlu1 %3137 }
0x112f   :  { %4334 = vrcp.f32 %v3138_v57 }
0x1132   :  { %v3373_v21 = vpop.xlane.xlu1 %3372 }
0x1133   :  { %3374 = vxpose.xlu1.b32.start.end [1/1] (short) (narrow) %v3373_v21, 8 }
0x1136   :  { %v3369_v62 = vpop.xlane.xlu1 %3368 }
0x1137   :  { %v3413_v48 = vsub.f32 1.0, %v3369_v62 }
0x1139   :  { %v4335_v60 = vpop.eup %4334  ;;  %v3423_v46 = vmul.f32 %v3413_v48, %v3413_v48 }
0x113a   :  { %v3140_v61 = vmul.f32 %v4335_v60, %v4333_v41 }
0x113c   :  { %3142 = vst.msk [vmem:[#allocation4 + $0x18] sm:$0xff] %vm319_vm2, %v3140_v61  ;;  %4128 = vmatmul.mubr.msk.f32.vlgmr.msra.gmra.mrb[34].mxu1 %vm319_vm2, %v3140_v61 }
0x113d   :  { %4136 = vmatpush3.xpose.msk.msra.mxu1 %vm319_vm2, %v4872_v54  ;;  %4137 = vmatprep.mubr.msk.f32.mxu1 %vm4403_vm1, %v4402_v23 }
0x113e   :  { %4145 = vmatprep.subr.mxu1 %v4402_v23 }
0x1140   :  { %4138 = vmatmul.mubr.msk.f32.vlgmr.msra.gmra.mrb[36].mxu1 %vm319_vm2, %v4863_v26 }
0x1141   :  { %4146 = vmatpush3.msra.mxu1 %v3766_v59  ;;  %4147 = vmatprep.mubr.msk.f32.mxu1 %vm4403_vm1, %v4402_v23 }
0x11b3   :  { %v3390_v54 = vpop.trf.xlu1 }
0x11b4   :  { %v3411_v6 = vrot.slane %v3390_v54, %v4562_v58 }
0x11b6   :  { %v3414_v11 = vmul.f32 %v3411_v6, %v3369_v62  ;;  %v3424_v52 = vmul.f32 %v3423_v46, %v3411_v6 }
0x120f   :  { %v3212_v63 = vpop.f32.mrb[34].mxu1 }
0x1210   :  { %v4129_v0 = vpop.f32.mrb[35].mxu1  ;;  %4133 = vmatmul.mubr.msk.f32.vlgmr.msra.gmra.mrb[28].mxu0 %vm319_vm2, %v3212_v63 }
0x1211   :  { %4141 = vmatpush3.msra.mxu0 %v2974_v56  ;;  %4142 = vmatprep.mubr.msk.f32.mxu0 %vm4403_vm1, %v4402_v23 }
0x1213   :  { %v3362_v1 = vpop.f32.mrb[36].mxu1 }
0x1214   :  { %v3406_v2 = vmul.f32 2.0, %v3362_v1  ;;  %v4139_v4 = vpop.f32.mrb[37].mxu1 }
0x1216   :  { %v3407_v26 = vsub.f32 1.0, %v3406_v2 }
0x1218   :  { %v3412_v3 = vadd.f32 %v3411_v6, %v3407_v26  ;;  %v3415_v16 = vadd.f32 %v3414_v11, %v3407_v26 }
0x121a   :  { %v3417_v7 = vmul.f32 %v3412_v3, %v3412_v3  ;;  %v3419_v5 = vmul.f32 2.0, %v3412_v3  ;;  %v3416_v12 = vmax.f32 %v3415_v16, 1e-15 }
0x121c   :  { %v3420_v17 = vmul.f32 %v3419_v5, %v3413_v48  ;;  %v3418_v8 = vmul.f32 %v3417_v7, %v3369_v62 }
0x121e   :  { %v3421_v9 = vmul.f32 %v3420_v17, %v3362_v1 }
0x1220   :  { %v3422_v14 = vsub.f32 %v3418_v8, %v3421_v9 }
0x1222   :  { %v3425_v23 = vadd.f32 %v3424_v52, %v3422_v14 }
0x1224   :  { %v3426_v18 = vmax.f32 %v3425_v23, 0.0 }
0x1226   :  { %4336 = vrsqrt.f32 %v3426_v18  ;;  %vm3429_vm1 = vcmp.eq.f32.partialorder %v3426_v18, inf  ;;  %v3432_v10 = vand.u32 2147483648, %v3426_v18  ;;  %vm3431_vm4 = vcmp.eq.f32.partialorder %v3426_v18, 0.0 }
0x1227   :  { %4338 = vrcp.f32 %v3416_v12 }
0x1230   :  { %v4337_v19 = vpop.eup %4336 }
0x1231   :  { %v3428_v58 = vmul.f32 %v4337_v19, %v3426_v18  ;;  %v4339_v22 = vpop.eup %4338 }
0x1233   :  { %v3430_v20 = vsel %vm3429_vm1, %v3426_v18, %v3428_v58 }
0x1234   :  { %v3433_v25 = vsel %vm3431_vm4, %v3432_v10, %v3430_v20 }
0x1235   :  { %v3435_v40 = vmul.f32 %v4339_v22, %v3433_v25 }
0x1237   :  { %v3774_v27 = vclamps-f32 %v3435_v40, 0.9999999 }
0x1239   :  { %v3439_v28 = vsub.f32 1.0, %v3774_v27  ;;  %v3438_v29 = vadd.f32 1.0, %v3774_v27 }
0x123b   :  { %4340 = vrcp.f32 %v3439_v28 }
0x1245   :  { %v4341_v30 = vpop.eup %4340 }
0x1246   :  { %v3441_v31 = vmul.f32 %v4341_v30, %v3438_v29 }
0x1248   :  { %4342 = vlog2.f32 %v3441_v31 }
0x1252   :  { %v4343_v32 = vpop.eup %4342 }
0x1253   :  { %v3443_v33 = vmul.f32 0.6931472, %v4343_v32 }
0x1255   :  { %v3444_v34 = vsub.f32 0.0, %v3443_v33 }
0x1257   :  { %v3445_v35 = vmul.f32 1.442695, %v3444_v34 }
0x1259   :  { %4344 = vpow2.f32 %v3445_v35 }
0x1263   :  { %v4345_v36 = vpop.eup %4344 }
0x1264   :  { %v3447_v15 = vsel %vm319_vm2, %v4345_v36, 0.0 }
0x1265   :  { %3448 = vadd.xlane.f32.xlu0 %v3447_v15 }
0x12e3   :  { %v3285_v38 = vpop.f32.mrb[28].mxu0 }
0x12e4   :  { %v3289_v45 = vadd.f32 %v3285_v38, %v4808_v13  ;;  %v4134_v39 = vpop.f32.mrb[29].mxu0 }
0x12e6   :  { %v3607_v41 = vadd.f32 %v3777_v37, %v3289_v45 }
0x12e8   :  { %3608 = vst.msk [vmem:[#allocation2] sm:$0xff] %vm48_vm0, %v3607_v41 }
0x12f2   :  { %v3449_v42 = vpop.xlane.xlu0 %3448 }
0x12f3   :  { %4346 = vrcp.f32 %v3449_v42 }
0x12fd   :  { %v4347_v43 = vpop.eup %4346 }
0x12fe   :  { %v3451_v44 = vmul.f32 %v4347_v43, %v4345_v36 }
0x1300   :  { %3453 = vst.msk [vmem:[#allocation4 + $0x38] sm:$0xff] %vm319_vm2, %v3451_v44  ;;  %4143 = vmatmul.mubr.msk.f32.vlgmr.msra.gmra.mrb[30].mxu0 %vm319_vm2, %v3451_v44 }
0x13d3   :  { %v3523_v47 = vpop.f32.mrb[30].mxu0 }
0x13d4   :  { %v4144_v50 = vpop.f32.mrb[31].mxu0  ;;  %4148 = vmatmul.mubr.msk.f32.vlgmr.msra.gmra.mrb[38].mxu1 %vm319_vm2, %v3523_v47 }
0x13d5   :  { %4365 = shalt.err (!%p4362_p4)
}
0x13d6   :  { %s4366_s0 = scalar_lea.hbm %s4973_s8, 1024 }
0x13d7   :  { %p4367_p5 = scmp.ne.s32.totalorder %s4973_s8, %s4366_s0  ;;  %p4370_p6 = scmp.lt.u32.totalorder %s4366_s0, %s4973_s8 }
0x13d9   :  { %p4372_p7 = pnand %p4370_p6, %p4367_p5 }
0x13db   :  { %4375 = shalt.err (!%p4372_p7)
}
0x13dc   :  { %s4405_s29 = smov 128   ;;  %s4406_s1 = smov 8  }
0x13dd   :  { %3634 = dma.vmem_to_hbm [thread:$0]  %s3629_s21, 1024, %s4973_s8, [#allocation5], %s4405_s29, %s4405_s29, %s4406_s1  }
0x13de   :  { %s4407_s10 = smov [#allocation2]  }
0x13df   :  { %s3616_s11 = sshll.u32 %s4407_s10, 4  ;;  %s3617_s11 = int_to_ptr.vmem [resolvable:$true] %s3616_s11 }
0x13e0   :  { %s4376_s12 = scalar_lea.vmem %s3617_s11, 256  ;;  %p4381_p9 = scmp.lt.s32.totalorder %s3617_s11, %s3617_s11 }
0x13e1   :  { %p4377_p8 = scmp.ne.s32.totalorder %s3617_s11, %s4376_s12  ;;  %p4382_p10 = scmp.lt.s32.totalorder %s4376_s12, %s4376_s12 }
0x13e3   :  { %p4383_p11 = por %p4382_p10, %p4381_p9 }
0x13e5   :  { %p4384_p12 = pnand %p4383_p11, %p4377_p8 }
0x14a7   :  { %v3596_v13 = vpop.f32.mrb[38].mxu1 }
0x14a8   :  { %v3600_v51 = vadd.f32 %v3596_v13, %v4867_v49  ;;  %v4149_v53 = vpop.f32.mrb[39].mxu1 }
0x14aa   :  { %v3609_v55 = vadd.f32 %v3777_v37, %v3600_v51 }
0x14ac   :  { %3610 = vst.msk [vmem:[#allocation2 + $0x8] sm:$0xff] %vm48_vm0, %v3609_v55 }
0x14ad   :  { %4387 = shalt.err (!%p4384_p12)
}
0x14ae   :  { %s4388_s8 = scalar_lea.hbm %s4972_s7, 256 }
0x14af   :  { %p4389_p13 = scmp.ne.s32.totalorder %s4972_s7, %s4388_s8  ;;  %p4392_p0 = scmp.lt.u32.totalorder %s4388_s8, %s4972_s7 }
0x14b1   :  { %p4394_p1 = pnand %p4392_p0, %p4389_p13 }
0x14b3   :  { %4397 = shalt.err (!%p4394_p1)
}
0x14b4   :  { %3622 = dma.vmem_to_hbm [thread:$0]  %s3617_s11, 256, %s4972_s7, [#allocation3], %s4405_s29, %s4405_s29, %s4406_s1  }
0x14b5   :  { %4398 = dma.done.wait [#allocation3], 256  }
0x14b6   :  { %4399 = vsyncadd [#allocation3], 4294967040 }
0x14b7   :  { %4400 = dma.done.wait [#allocation5], 1024  }
0x14b8   :  { %4401 = vsyncadd [#allocation5], 4294966272 }
0x14b9   :  { %3641 = vsyncpa [#allocation3], 1 }
0x14ba   :  { %3642 = vsyncpa [#allocation5], 1 }

</bundles_post_ra>
